<compile_context>
chip_gen: v6e
topology: v6e:2x2x1
jax: 0.10.0
libtpu: 0.0.40
codegen_flags: <defaults>
</compile_context>

<pallas_src>
import jax
import jax.numpy as jnp
from jax.experimental import pallas as pl
from jax.experimental.pallas import tpu as pltpu


def _round_up(x, m):
    return ((x + m - 1) // m) * m


def _lstm_fc_kernel(x_ref, wih_ref, whh_ref, b_ref, wfc_ref, bfc_ref,
                    out_ref, gx_ref, h_ref, c_ref):
    """Per (batch-tile b, time-chunk t) grid step.

    x_ref:   (TC*BT, Ep) bf16   current time-chunk of embedded tokens (time-major groups of BT rows)
    wih_ref: (Ep, 4H)    bf16   gate columns reordered to (i, f, o, g)
    whh_ref: (H, 4H)     f32    recurrent weights kept f32 (state accuracy)
    b_ref:   (1, 4H)     f32    b_ih + b_hh, reordered
    wfc_ref: (H, Op)     bf16
    bfc_ref: (1, Op)     f32
    out_ref: (BT, Op)    f32    written only on the last time chunk
    gx_ref:  (TC*BT, 4H) bf16   VMEM scratch: hoisted input projection for this chunk
    h_ref/c_ref: (BT, H) f32    VMEM scratch carried across the time-chunk axis
    """
    t_chunk = pl.program_id(1)
    BT = out_ref.shape[0]
    H = whh_ref.shape[0]
    TC = gx_ref.shape[0] // BT

    # Hoisted input projection + bias for the whole chunk: one large-M bf16 MXU matmul
    # off the serial recurrence chain; result quantized to bf16 in VMEM.
    gx_ref[...] = (
        jnp.dot(x_ref[...], wih_ref[...], preferred_element_type=jnp.float32)
        + b_ref[...]
    ).astype(jnp.bfloat16)

    @pl.when(t_chunk == 0)
    def _():
        h_ref[...] = jnp.zeros_like(h_ref)
        c_ref[...] = jnp.zeros_like(c_ref)

    def step(t, carry):
        h, c = carry
        start = pl.multiple_of(t * BT, BT)
        # One f32 matmul on the serial chain; gx (bf16) upconverts for free on the add.
        gates = gx_ref[pl.ds(start, BT), :].astype(jnp.float32) + jnp.dot(
            h, whh_ref[...], preferred_element_type=jnp.float32)
        # Gate columns are (i, f, o, g): one wide sigmoid (as 0.5*tanh(0.5x)+0.5 ->
        # single EUP push), one tanh for the cell candidate.
        sig = 0.5 * jnp.tanh(0.5 * gates[:, :3 * H]) + 0.5
        g_g = jnp.tanh(gates[:, 3 * H:])
        i_g = sig[:, 0 * H:1 * H]
        f_g = sig[:, 1 * H:2 * H]
        o_g = sig[:, 2 * H:3 * H]
        c_new = f_g * c + i_g * g_g
        h_new = o_g * jnp.tanh(c_new)
        return (h_new, c_new)

    h_n, c_n = jax.lax.fori_loop(0, TC, step, (h_ref[...], c_ref[...]), unroll=4)
    h_ref[...] = h_n
    c_ref[...] = c_n

    @pl.when(t_chunk == pl.num_programs(1) - 1)
    def _():
        # Final FC on the last hidden state; output block is lane-dense (Op = 128k).
        out_ref[...] = (
            jnp.dot(h_n.astype(wfc_ref.dtype), wfc_ref[...],
                    preferred_element_type=jnp.float32)
            + bfc_ref[...]
        )


def sentiment_lstm_forward(tokens, params, *, time_chunk=4, batch_tile=8):
    """tokens: (B, T) int32.  Returns logits (B, output_size) float32."""
    emb_table = params["embedding"]          # (V, E), row 0 == 0 (padding_idx)
    w_ih = params["w_ih"]                    # (4H, E)   PyTorch gate order i,f,g,o
    w_hh = params["w_hh"]                    # (4H, H)
    b_ih = params["b_ih"]                    # (4H,)
    b_hh = params["b_hh"]                    # (4H,)
    w_fc = params["w_fc"]                    # (O, H)
    b_fc = params["b_fc"]                    # (O,)

    B, T = tokens.shape
    V, E = emb_table.shape
    H = w_hh.shape[1]
    O = w_fc.shape[0]

    BT = _round_up(max(batch_tile, 8), 8)    # batch tile (sublane-aligned)
    Bp = _round_up(max(B, BT), BT)
    NB = Bp // BT
    Ep = _round_up(E, 128)                   # clean 128-K contraction
    Op = _round_up(O, 128)                   # lane-dense output store

    # Time-chunk size must divide T exactly (extra LSTM steps on padded time would
    # corrupt the final hidden state): largest divisor of T not exceeding time_chunk.
    TC = min(max(time_chunk, 1), T)
    while T % TC:
        TC -= 1
    NT = T // TC

    # --- weight prep (once, wrapper-side) -----------------------------------
    def _reorder_gates(w):   # PyTorch (i, f, g, o) -> kernel (i, f, o, g) along axis 0
        i, f, g, o = jnp.split(w, 4, axis=0)
        return jnp.concatenate([i, f, o, g], axis=0)

    w_ih_r = _reorder_gates(w_ih)                                    # (4H, E)
    w_hh_r = _reorder_gates(w_hh)                                    # (4H, H)
    bias_r = _reorder_gates(b_ih + b_hh)                             # (4H,)

    wih_t = jnp.pad(w_ih_r, ((0, 0), (0, Ep - E))).T.astype(jnp.bfloat16)   # (Ep, 4H)
    whh_t = w_hh_r.T.astype(jnp.float32)                                    # (H, 4H) f32
    bias = bias_r.reshape(1, 4 * H).astype(jnp.float32)                     # (1, 4H)
    wfc_t = jnp.pad(w_fc.T.astype(jnp.float32),
                    ((0, 0), (0, Op - O))).astype(jnp.bfloat16)             # (H, Op)
    bfc = jnp.pad(b_fc.astype(jnp.float32), (0, Op - O)).reshape(1, Op)     # (1, Op)

    # --- embedding gather (bf16, no f32 round-trip) --------------------------
    # TODO(synk): at realistic vocab/T, scalar-prefetch token ids and DMA-gather
    # embedding rows inside the kernel instead of this XLA gather.
    emb_bf16 = emb_table.astype(jnp.bfloat16)
    x = emb_bf16[tokens.T]                                   # (T, B, E) bf16
    x = jnp.pad(x, ((0, 0), (0, Bp - B), (0, Ep - E)))       # (T, Bp, Ep)
    # Rearrange to (NB, T*BT, Ep): rows for batch-tile nb are [t*BT + i] = (time t, lane i).
    x = x.reshape(T, NB, BT, Ep).transpose(1, 0, 2, 3).reshape(NB, T * BT, Ep)

    out = pl.pallas_call(
        _lstm_fc_kernel,
        out_shape=jax.ShapeDtypeStruct((Bp, Op), jnp.float32),
        grid=(NB, NT),
        in_specs=[
            pl.BlockSpec((pl.Squeezed(), TC * BT, Ep), lambda b, t: (b, t, 0)),
            pl.BlockSpec((Ep, 4 * H), lambda b, t: (0, 0)),
            pl.BlockSpec((H, 4 * H), lambda b, t: (0, 0)),
            pl.BlockSpec((1, 4 * H), lambda b, t: (0, 0)),
            pl.BlockSpec((H, Op), lambda b, t: (0, 0)),
            pl.BlockSpec((1, Op), lambda b, t: (0, 0)),
        ],
        out_specs=pl.BlockSpec((BT, Op), lambda b, t: (b, 0)),
        scratch_shapes=[
            pltpu.VMEM((TC * BT, 4 * H), jnp.bfloat16),   # gx (hoisted input projection)
            pltpu.VMEM((BT, H), jnp.float32),             # h carried across time chunks
            pltpu.VMEM((BT, H), jnp.float32),             # c carried across time chunks
        ],
        compiler_params=pltpu.CompilerParams(
            dimension_semantics=("parallel", "arbitrary"),
            vmem_limit_bytes=32 * 1024 * 1024,
        ),
    )(x, wih_t, whh_t, bias, wfc_t, bfc)
    return out[:B, :O]


def _reference_forward(tokens, params):
    """Pure-JAX reference (lax.scan LSTM, PyTorch gate order) for correctness check."""
    emb = params["embedding"][tokens].astype(jnp.float32)     # (B, T, E)
    B, T, E = emb.shape
    H = params["w_hh"].shape[1]
    w_ih_t = params["w_ih"].T
    w_hh_t = params["w_hh"].T
    bias = params["b_ih"] + params["b_hh"]

    def step(carry, x_t):
        h, c = carry
        gates = x_t @ w_ih_t + h @ w_hh_t + bias
        i = jax.nn.sigmoid(gates[:, 0 * H:1 * H])
        f = jax.nn.sigmoid(gates[:, 1 * H:2 * H])
        g = jnp.tanh(gates[:, 2 * H:3 * H])
        o = jax.nn.sigmoid(gates[:, 3 * H:4 * H])
        c = f * c + i * g
        h = o * jnp.tanh(c)
        return (h, c), None

    h0 = jnp.zeros((B, H), jnp.float32)
    c0 = jnp.zeros((B, H), jnp.float32)
    (h_n, _), _ = jax.lax.scan(step, (h0, c0), jnp.transpose(emb, (1, 0, 2)))
    return h_n @ params["w_fc"].T + params["b_fc"]


def make_params(key, vocab_size, embed_size, hidden_size, output_size):
    ks = jax.random.split(key, 7)
    scale = 0.1
    emb = jax.random.normal(ks[0], (vocab_size, embed_size), jnp.float32) * scale
    emb = emb.at[0].set(0.0)   # padding_idx=0
    return {
        "embedding": emb,
        "w_ih": jax.random.normal(ks[1], (4 * hidden_size, embed_size), jnp.float32) * scale,
        "w_hh": jax.random.normal(ks[2], (4 * hidden_size, hidden_size), jnp.float32) * scale,
        "b_ih": jax.random.normal(ks[3], (4 * hidden_size,), jnp.float32) * scale,
        "b_hh": jax.random.normal(ks[4], (4 * hidden_size,), jnp.float32) * scale,
        "w_fc": jax.random.normal(ks[5], (output_size, hidden_size), jnp.float32) * scale,
        "b_fc": jax.random.normal(ks[6], (output_size,), jnp.float32) * scale,
    }


if __name__ == "__main__":
    vocab_size = 50
    embed_size = 100
    hidden_size = 128
    output_size = 2
    batch = 2
    seq_len = 8

    key = jax.random.PRNGKey(0)
    k_par, k_tok = jax.random.split(key)
    params = make_params(k_par, vocab_size, embed_size, hidden_size, output_size)
    tokens = jax.random.randint(k_tok, (batch, seq_len), 0, vocab_size, dtype=jnp.int32)

    # time_chunk=4 -> two time chunks at T=8, exercising the h/c carry across the grid.
    fwd = jax.jit(lambda t, p: sentiment_lstm_forward(t, p, time_chunk=4, batch_tile=8))
    out = jax.block_until_ready(fwd(tokens, params))

    ref = _reference_forward(tokens, params)
    assert out.shape == (batch, output_size)
    assert jnp.all(jnp.isfinite(out))
    # bf16 matmul inputs / bf16 gx scratch (f32 accumulation, f32 recurrence)
    # => slightly looser tolerance than pure f32.
    assert jnp.allclose(out, ref, atol=3e-2, rtol=2e-2), (out, ref)

    print("KERNEL_OK")
</pallas_src>

<mosaic_0001>
module attributes {stable_mosaic.version = 11 : i64} {
  func.func @_lstm_fc_kernel(%arg0: i32, %arg1: i32, %arg2: memref<1x32x128xbf16, #tpu.memory_space<vmem>>, %arg3: memref<128x512xbf16, #tpu.memory_space<vmem>>, %arg4: memref<128x512xf32, #tpu.memory_space<vmem>>, %arg5: memref<1x512xf32, #tpu.memory_space<vmem>>, %arg6: memref<128x128xbf16, #tpu.memory_space<vmem>>, %arg7: memref<1x128xf32, #tpu.memory_space<vmem>>, %arg8: memref<8x128xf32, #tpu.memory_space<vmem>>, %arg9: memref<32x512xbf16, #tpu.memory_space<vmem>>, %arg10: memref<8x128xf32, #tpu.memory_space<vmem>>, %arg11: memref<8x128xf32, #tpu.memory_space<vmem>>) attributes {dimension_semantics = [#tpu.dimension_semantics<parallel>, #tpu.dimension_semantics<arbitrary>], iteration_bounds = array<i64: 1, 2>, scalar_prefetch = 0 : i64, scratch_operands = 3 : i64, tpu.core_type = #tpu.core_type<tc>, window_params = [{transform_indices = @transform_0, window_bounds = array<i64: 1, 32, 128>}, {pipeline_mode = #tpu.pipeline_mode<synchronous>, transform_indices = @transform_1, window_bounds = array<i64: 128, 512>}, {pipeline_mode = #tpu.pipeline_mode<synchronous>, transform_indices = @transform_2, window_bounds = array<i64: 128, 512>}, {pipeline_mode = #tpu.pipeline_mode<synchronous>, transform_indices = @transform_3, window_bounds = array<i64: 1, 512>}, {pipeline_mode = #tpu.pipeline_mode<synchronous>, transform_indices = @transform_4, window_bounds = array<i64: 128, 128>}, {pipeline_mode = #tpu.pipeline_mode<synchronous>, transform_indices = @transform_5, window_bounds = array<i64: 1, 128>}, {transform_indices = @transform_6, window_bounds = array<i64: 8, 128>}]} {
    %c0 = arith.constant 0 : index
    %c0_0 = arith.constant 0 : index
    %c0_1 = arith.constant 0 : index
    %0 = vector.load %arg2[%c0, %c0_0, %c0_1] : memref<1x32x128xbf16, #tpu.memory_space<vmem>>, vector<1x32x128xbf16>
    %1 = vector.shape_cast %0 : vector<1x32x128xbf16> to vector<32x128xbf16>
    %c0_2 = arith.constant 0 : index
    %c0_3 = arith.constant 0 : index
    %2 = vector.load %arg3[%c0_2, %c0_3] : memref<128x512xbf16, #tpu.memory_space<vmem>>, vector<128x512xbf16>
    %cst = arith.constant dense<0.000000e+00> : vector<32x512xf32>
    %3 = tpu.matmul %1, %2, %cst {dimension_numbers = #tpu.dot_dimension_numbers<[1], [0], [0], [1], [0, 0, 1, 1], [], []>} : vector<32x128xbf16>, vector<128x512xbf16>, vector<32x512xf32> -> vector<32x512xf32>
    %c0_4 = arith.constant 0 : index
    %c0_5 = arith.constant 0 : index
    %4 = vector.load %arg5[%c0_4, %c0_5] : memref<1x512xf32, #tpu.memory_space<vmem>>, vector<1x512xf32>
    %5 = vector.broadcast %4 : vector<1x512xf32> to vector<32x512xf32>
    %6 = arith.addf %3, %5 : vector<32x512xf32>
    %7 = arith.truncf %6 : vector<32x512xf32> to vector<32x512xbf16>
    %c0_6 = arith.constant 0 : index
    %c0_7 = arith.constant 0 : index
    %8 = vector.load %arg9[%c0_6, %c0_7] : memref<32x512xbf16, #tpu.memory_space<vmem>>, vector<32x512xbf16>
    tpu.vector_store %arg9[%c0_6, %c0_7], %7 {strides = array<i32>} : memref<32x512xbf16, #tpu.memory_space<vmem>>, vector<32x512xbf16>,
    %c0_i32 = arith.constant 0 : i32
    %9 = arith.cmpi eq, %arg1, %c0_i32 : i32
    %10 = arith.extui %9 : i1 to i32
    %c0_i32_8 = arith.constant 0 : i32
    %11 = arith.cmpi ne, %10, %c0_i32_8 : i32
    scf.if %11 {
      %cst_51 = arith.constant 0.000000e+00 : f32
      %123 = vector.broadcast %cst_51 : f32 to vector<8x128xf32>
      %c0_52 = arith.constant 0 : index
      %c0_53 = arith.constant 0 : index
      %124 = vector.load %arg10[%c0_52, %c0_53] : memref<8x128xf32, #tpu.memory_space<vmem>>, vector<8x128xf32>
      tpu.vector_store %arg10[%c0_52, %c0_53], %123 {strides = array<i32>} : memref<8x128xf32, #tpu.memory_space<vmem>>, vector<8x128xf32>,
      %cst_54 = arith.constant 0.000000e+00 : f32
      %125 = vector.broadcast %cst_54 : f32 to vector<8x128xf32>
      %c0_55 = arith.constant 0 : index
      %c0_56 = arith.constant 0 : index
      %126 = vector.load %arg11[%c0_55, %c0_56] : memref<8x128xf32, #tpu.memory_space<vmem>>, vector<8x128xf32>
      tpu.vector_store %arg11[%c0_55, %c0_56], %125 {strides = array<i32>} : memref<8x128xf32, #tpu.memory_space<vmem>>, vector<8x128xf32>,
    } else {
    }
    %c0_9 = arith.constant 0 : index
    %c0_10 = arith.constant 0 : index
    %12 = vector.load %arg10[%c0_9, %c0_10] : memref<8x128xf32, #tpu.memory_space<vmem>>, vector<8x128xf32>
    %c0_11 = arith.constant 0 : index
    %c0_12 = arith.constant 0 : index
    %13 = vector.load %arg11[%c0_11, %c0_12] : memref<8x128xf32, #tpu.memory_space<vmem>>, vector<8x128xf32>
    %c0_i32_13 = arith.constant 0 : i32
    %c8_i32 = arith.constant 8 : i32
    %14 = arith.muli %c0_i32_13, %c8_i32 : i32
    %15 = tpu.assume_multiple %14, 8 : i32
    %16 = arith.index_cast %15 : i32 to index
    %c0_14 = arith.constant 0 : index
    %17 = vector.load %arg9[%16, %c0_14] : memref<32x512xbf16, #tpu.memory_space<vmem>>, vector<8x512xbf16>
    %18 = arith.extf %17 : vector<8x512xbf16> to vector<8x512xf32>
    %c0_15 = arith.constant 0 : index
    %c0_16 = arith.constant 0 : index
    %19 = vector.load %arg4[%c0_15, %c0_16] : memref<128x512xf32, #tpu.memory_space<vmem>>, vector<128x512xf32>
    %cst_17 = arith.constant dense<0.000000e+00> : vector<8x512xf32>
    %20 = tpu.matmul %12, %19, %cst_17 {dimension_numbers = #tpu.dot_dimension_numbers<[1], [0], [0], [1], [0, 0, 1, 1], [], []>} : vector<8x128xf32>, vector<128x512xf32>, vector<8x512xf32> -> vector<8x512xf32>
    %21 = arith.addf %18, %20 : vector<8x512xf32>
    %22 = vector.extract_strided_slice %21 {offsets = [0, 0], sizes = [8, 384], strides = [1, 1]} : vector<8x512xf32> to vector<8x384xf32>
    %cst_18 = arith.constant 5.000000e-01 : f32
    %23 = vector.broadcast %cst_18 : f32 to vector<8x384xf32>
    %24 = arith.mulf %23, %22 : vector<8x384xf32>
    %25 = math.tanh %24 : vector<8x384xf32>
    %cst_19 = arith.constant 5.000000e-01 : f32
    %26 = vector.broadcast %cst_19 : f32 to vector<8x384xf32>
    %27 = arith.mulf %26, %25 : vector<8x384xf32>
    %cst_20 = arith.constant 5.000000e-01 : f32
    %28 = vector.broadcast %cst_20 : f32 to vector<8x384xf32>
    %29 = arith.addf %27, %28 : vector<8x384xf32>
    %30 = vector.extract_strided_slice %21 {offsets = [0, 384], sizes = [8, 128], strides = [1, 1]} : vector<8x512xf32> to vector<8x128xf32>
    %31 = math.tanh %30 : vector<8x128xf32>
    %32 = vector.extract_strided_slice %29 {offsets = [0, 0], sizes = [8, 128], strides = [1, 1]} : vector<8x384xf32> to vector<8x128xf32>
    %33 = vector.extract_strided_slice %29 {offsets = [0, 128], sizes = [8, 128], strides = [1, 1]} : vector<8x384xf32> to vector<8x128xf32>
    %34 = vector.extract_strided_slice %29 {offsets = [0, 256], sizes = [8, 128], strides = [1, 1]} : vector<8x384xf32> to vector<8x128xf32>
    %35 = arith.mulf %33, %13 : vector<8x128xf32>
    %36 = arith.mulf %32, %31 : vector<8x128xf32>
    %37 = arith.addf %35, %36 : vector<8x128xf32>
    %38 = math.tanh %37 : vector<8x128xf32>
    %39 = arith.mulf %34, %38 : vector<8x128xf32>
    %c1_i32 = arith.constant 1 : i32
    %c8_i32_21 = arith.constant 8 : i32
    %40 = arith.muli %c1_i32, %c8_i32_21 : i32
    %41 = tpu.assume_multiple %40, 8 : i32
    %42 = arith.index_cast %41 : i32 to index
    %c0_22 = arith.constant 0 : index
    %43 = vector.load %arg9[%42, %c0_22] : memref<32x512xbf16, #tpu.memory_space<vmem>>, vector<8x512xbf16>
    %44 = arith.extf %43 : vector<8x512xbf16> to vector<8x512xf32>
    %c0_23 = arith.constant 0 : index
    %c0_24 = arith.constant 0 : index
    %45 = vector.load %arg4[%c0_23, %c0_24] : memref<128x512xf32, #tpu.memory_space<vmem>>, vector<128x512xf32>
    %cst_25 = arith.constant dense<0.000000e+00> : vector<8x512xf32>
    %46 = tpu.matmul %39, %45, %cst_25 {dimension_numbers = #tpu.dot_dimension_numbers<[1], [0], [0], [1], [0, 0, 1, 1], [], []>} : vector<8x128xf32>, vector<128x512xf32>, vector<8x512xf32> -> vector<8x512xf32>
    %47 = arith.addf %44, %46 : vector<8x512xf32>
    %48 = vector.extract_strided_slice %47 {offsets = [0, 0], sizes = [8, 384], strides = [1, 1]} : vector<8x512xf32> to vector<8x384xf32>
    %cst_26 = arith.constant 5.000000e-01 : f32
    %49 = vector.broadcast %cst_26 : f32 to vector<8x384xf32>
    %50 = arith.mulf %49, %48 : vector<8x384xf32>
    %51 = math.tanh %50 : vector<8x384xf32>
    %cst_27 = arith.constant 5.000000e-01 : f32
    %52 = vector.broadcast %cst_27 : f32 to vector<8x384xf32>
    %53 = arith.mulf %52, %51 : vector<8x384xf32>
    %cst_28 = arith.constant 5.000000e-01 : f32
    %54 = vector.broadcast %cst_28 : f32 to vector<8x384xf32>
    %55 = arith.addf %53, %54 : vector<8x384xf32>
    %56 = vector.extract_strided_slice %47 {offsets = [0, 384], sizes = [8, 128], strides = [1, 1]} : vector<8x512xf32> to vector<8x128xf32>
    %57 = math.tanh %56 : vector<8x128xf32>
    %58 = vector.extract_strided_slice %55 {offsets = [0, 0], sizes = [8, 128], strides = [1, 1]} : vector<8x384xf32> to vector<8x128xf32>
    %59 = vector.extract_strided_slice %55 {offsets = [0, 128], sizes = [8, 128], strides = [1, 1]} : vector<8x384xf32> to vector<8x128xf32>
    %60 = vector.extract_strided_slice %55 {offsets = [0, 256], sizes = [8, 128], strides = [1, 1]} : vector<8x384xf32> to vector<8x128xf32>
    %61 = arith.mulf %59, %37 : vector<8x128xf32>
    %62 = arith.mulf %58, %57 : vector<8x128xf32>
    %63 = arith.addf %61, %62 : vector<8x128xf32>
    %64 = math.tanh %63 : vector<8x128xf32>
    %65 = arith.mulf %60, %64 : vector<8x128xf32>
    %c2_i32 = arith.constant 2 : i32
    %c8_i32_29 = arith.constant 8 : i32
    %66 = arith.muli %c2_i32, %c8_i32_29 : i32
    %67 = tpu.assume_multiple %66, 8 : i32
    %68 = arith.index_cast %67 : i32 to index
    %c0_30 = arith.constant 0 : index
    %69 = vector.load %arg9[%68, %c0_30] : memref<32x512xbf16, #tpu.memory_space<vmem>>, vector<8x512xbf16>
    %70 = arith.extf %69 : vector<8x512xbf16> to vector<8x512xf32>
    %c0_31 = arith.constant 0 : index
    %c0_32 = arith.constant 0 : index
    %71 = vector.load %arg4[%c0_31, %c0_32] : memref<128x512xf32, #tpu.memory_space<vmem>>, vector<128x512xf32>
    %cst_33 = arith.constant dense<0.000000e+00> : vector<8x512xf32>
    %72 = tpu.matmul %65, %71, %cst_33 {dimension_numbers = #tpu.dot_dimension_numbers<[1], [0], [0], [1], [0, 0, 1, 1], [], []>} : vector<8x128xf32>, vector<128x512xf32>, vector<8x512xf32> -> vector<8x512xf32>
    %73 = arith.addf %70, %72 : vector<8x512xf32>
    %74 = vector.extract_strided_slice %73 {offsets = [0, 0], sizes = [8, 384], strides = [1, 1]} : vector<8x512xf32> to vector<8x384xf32>
    %cst_34 = arith.constant 5.000000e-01 : f32
    %75 = vector.broadcast %cst_34 : f32 to vector<8x384xf32>
    %76 = arith.mulf %75, %74 : vector<8x384xf32>
    %77 = math.tanh %76 : vector<8x384xf32>
    %cst_35 = arith.constant 5.000000e-01 : f32
    %78 = vector.broadcast %cst_35 : f32 to vector<8x384xf32>
    %79 = arith.mulf %78, %77 : vector<8x384xf32>
    %cst_36 = arith.constant 5.000000e-01 : f32
    %80 = vector.broadcast %cst_36 : f32 to vector<8x384xf32>
    %81 = arith.addf %79, %80 : vector<8x384xf32>
    %82 = vector.extract_strided_slice %73 {offsets = [0, 384], sizes = [8, 128], strides = [1, 1]} : vector<8x512xf32> to vector<8x128xf32>
    %83 = math.tanh %82 : vector<8x128xf32>
    %84 = vector.extract_strided_slice %81 {offsets = [0, 0], sizes = [8, 128], strides = [1, 1]} : vector<8x384xf32> to vector<8x128xf32>
    %85 = vector.extract_strided_slice %81 {offsets = [0, 128], sizes = [8, 128], strides = [1, 1]} : vector<8x384xf32> to vector<8x128xf32>
    %86 = vector.extract_strided_slice %81 {offsets = [0, 256], sizes = [8, 128], strides = [1, 1]} : vector<8x384xf32> to vector<8x128xf32>
    %87 = arith.mulf %85, %63 : vector<8x128xf32>
    %88 = arith.mulf %84, %83 : vector<8x128xf32>
    %89 = arith.addf %87, %88 : vector<8x128xf32>
    %90 = math.tanh %89 : vector<8x128xf32>
    %91 = arith.mulf %86, %90 : vector<8x128xf32>
    %c3_i32 = arith.constant 3 : i32
    %c8_i32_37 = arith.constant 8 : i32
    %92 = arith.muli %c3_i32, %c8_i32_37 : i32
    %93 = tpu.assume_multiple %92, 8 : i32
    %94 = arith.index_cast %93 : i32 to index
    %c0_38 = arith.constant 0 : index
    %95 = vector.load %arg9[%94, %c0_38] : memref<32x512xbf16, #tpu.memory_space<vmem>>, vector<8x512xbf16>
    %96 = arith.extf %95 : vector<8x512xbf16> to vector<8x512xf32>
    %c0_39 = arith.constant 0 : index
    %c0_40 = arith.constant 0 : index
    %97 = vector.load %arg4[%c0_39, %c0_40] : memref<128x512xf32, #tpu.memory_space<vmem>>, vector<128x512xf32>
    %cst_41 = arith.constant dense<0.000000e+00> : vector<8x512xf32>
    %98 = tpu.matmul %91, %97, %cst_41 {dimension_numbers = #tpu.dot_dimension_numbers<[1], [0], [0], [1], [0, 0, 1, 1], [], []>} : vector<8x128xf32>, vector<128x512xf32>, vector<8x512xf32> -> vector<8x512xf32>
    %99 = arith.addf %96, %98 : vector<8x512xf32>
    %100 = vector.extract_strided_slice %99 {offsets = [0, 0], sizes = [8, 384], strides = [1, 1]} : vector<8x512xf32> to vector<8x384xf32>
    %cst_42 = arith.constant 5.000000e-01 : f32
    %101 = vector.broadcast %cst_42 : f32 to vector<8x384xf32>
    %102 = arith.mulf %101, %100 : vector<8x384xf32>
    %103 = math.tanh %102 : vector<8x384xf32>
    %cst_43 = arith.constant 5.000000e-01 : f32
    %104 = vector.broadcast %cst_43 : f32 to vector<8x384xf32>
    %105 = arith.mulf %104, %103 : vector<8x384xf32>
    %cst_44 = arith.constant 5.000000e-01 : f32
    %106 = vector.broadcast %cst_44 : f32 to vector<8x384xf32>
    %107 = arith.addf %105, %106 : vector<8x384xf32>
    %108 = vector.extract_strided_slice %99 {offsets = [0, 384], sizes = [8, 128], strides = [1, 1]} : vector<8x512xf32> to vector<8x128xf32>
    %109 = math.tanh %108 : vector<8x128xf32>
    %110 = vector.extract_strided_slice %107 {offsets = [0, 0], sizes = [8, 128], strides = [1, 1]} : vector<8x384xf32> to vector<8x128xf32>
    %111 = vector.extract_strided_slice %107 {offsets = [0, 128], sizes = [8, 128], strides = [1, 1]} : vector<8x384xf32> to vector<8x128xf32>
    %112 = vector.extract_strided_slice %107 {offsets = [0, 256], sizes = [8, 128], strides = [1, 1]} : vector<8x384xf32> to vector<8x128xf32>
    %113 = arith.mulf %111, %89 : vector<8x128xf32>
    %114 = arith.mulf %110, %109 : vector<8x128xf32>
    %115 = arith.addf %113, %114 : vector<8x128xf32>
    %116 = math.tanh %115 : vector<8x128xf32>
    %117 = arith.mulf %112, %116 : vector<8x128xf32>
    %c4_i32 = arith.constant 4 : i32
    %c0_45 = arith.constant 0 : index
    %c0_46 = arith.constant 0 : index
    %118 = vector.load %arg10[%c0_45, %c0_46] : memref<8x128xf32, #tpu.memory_space<vmem>>, vector<8x128xf32>
    tpu.vector_store %arg10[%c0_45, %c0_46], %117 {strides = array<i32>} : memref<8x128xf32, #tpu.memory_space<vmem>>, vector<8x128xf32>,
    %c0_47 = arith.constant 0 : index
    %c0_48 = arith.constant 0 : index
    %119 = vector.load %arg11[%c0_47, %c0_48] : memref<8x128xf32, #tpu.memory_space<vmem>>, vector<8x128xf32>
    tpu.vector_store %arg11[%c0_47, %c0_48], %115 {strides = array<i32>} : memref<8x128xf32, #tpu.memory_space<vmem>>, vector<8x128xf32>,
    %c1_i32_49 = arith.constant 1 : i32
    %120 = arith.cmpi eq, %arg1, %c1_i32_49 : i32
    %121 = arith.extui %120 : i1 to i32
    %c0_i32_50 = arith.constant 0 : i32
    %122 = arith.cmpi ne, %121, %c0_i32_50 : i32
    scf.if %122 {
      %123 = arith.truncf %117 : vector<8x128xf32> to vector<8x128xbf16>
      %c0_51 = arith.constant 0 : index
      %c0_52 = arith.constant 0 : index
      %124 = vector.load %arg6[%c0_51, %c0_52] : memref<128x128xbf16, #tpu.memory_space<vmem>>, vector<128x128xbf16>
      %cst_53 = arith.constant dense<0.000000e+00> : vector<8x128xf32>
      %125 = tpu.matmul %123, %124, %cst_53 {dimension_numbers = #tpu.dot_dimension_numbers<[1], [0], [0], [1], [0, 0, 1, 1], [], []>} : vector<8x128xbf16>, vector<128x128xbf16>, vector<8x128xf32> -> vector<8x128xf32>
      %c0_54 = arith.constant 0 : index
      %c0_55 = arith.constant 0 : index
      %126 = vector.load %arg7[%c0_54, %c0_55] : memref<1x128xf32, #tpu.memory_space<vmem>>, vector<1x128xf32>
      %127 = vector.broadcast %126 : vector<1x128xf32> to vector<8x128xf32>
      %128 = arith.addf %125, %127 : vector<8x128xf32>
      %c0_56 = arith.constant 0 : index
      %c0_57 = arith.constant 0 : index
      %129 = vector.load %arg8[%c0_56, %c0_57] : memref<8x128xf32, #tpu.memory_space<vmem>>, vector<8x128xf32>
      tpu.vector_store %arg8[%c0_56, %c0_57], %128 {strides = array<i32>} : memref<8x128xf32, #tpu.memory_space<vmem>>, vector<8x128xf32>,
    } else {
    }
    return
  }
  func.func @transform_0(%arg0: i32, %arg1: i32) -> (i32, i32, i32) {
    %c0_i32 = arith.constant 0 : i32
    %c0_i32_0 = arith.constant 0 : i32
    return %arg0, %arg1, %c0_i32 : i32, i32, i32
  }
  func.func @transform_1(%arg0: i32, %arg1: i32) -> (i32, i32) {
    %c0_i32 = arith.constant 0 : i32
    %c0_i32_0 = arith.constant 0 : i32
    %c0_i32_1 = arith.constant 0 : i32
    return %c0_i32, %c0_i32_0 : i32, i32
  }
  func.func @transform_2(%arg0: i32, %arg1: i32) -> (i32, i32) {
    %c0_i32 = arith.constant 0 : i32
    %c0_i32_0 = arith.constant 0 : i32
    %c0_i32_1 = arith.constant 0 : i32
    return %c0_i32, %c0_i32_0 : i32, i32
  }
  func.func @transform_3(%arg0: i32, %arg1: i32) -> (i32, i32) {
    %c0_i32 = arith.constant 0 : i32
    %c0_i32_0 = arith.constant 0 : i32
    %c0_i32_1 = arith.constant 0 : i32
    return %c0_i32, %c0_i32_0 : i32, i32
  }
  func.func @transform_4(%arg0: i32, %arg1: i32) -> (i32, i32) {
    %c0_i32 = arith.constant 0 : i32
    %c0_i32_0 = arith.constant 0 : i32
    %c0_i32_1 = arith.constant 0 : i32
    return %c0_i32, %c0_i32_0 : i32, i32
  }
  func.func @transform_5(%arg0: i32, %arg1: i32) -> (i32, i32) {
    %c0_i32 = arith.constant 0 : i32
    %c0_i32_0 = arith.constant 0 : i32
    %c0_i32_1 = arith.constant 0 : i32
    return %c0_i32, %c0_i32_0 : i32, i32
  }
  func.func @transform_6(%arg0: i32, %arg1: i32) -> (i32, i32) {
    %c0_i32 = arith.constant 0 : i32
    %c0_i32_0 = arith.constant 0 : i32
    return %arg0, %c0_i32 : i32, i32
  }
}

</mosaic_0001>

<bundles_post_ra>
// kernel: _lambda_.1
= control target key start
LH: loop header
LB: loop body
LE: loop exit
PB: predicated region body
PF: predicated region fallthrough
CT: control target
= control target key end

     0   :  { %s1912_s21 = smov 0   ;;  %s1914_s22 = smov 0   ;;  %s2672_s0 = inlined_call_operand.vmem [shape: bf16[1,64,128], index: 0, kind: input, shape index: {}]   ;;  %s2673_s1 = inlined_call_operand.vmem [shape: bf16[128,512], index: 1, kind: input, shape index: {}]   ;;  %s2674_s2 = inlined_call_operand.vmem [shape: f32[128,512], index: 2, kind: input, shape index: {}]   ;;  %s2675_s3 = inlined_call_operand.vmem [shape: f32[1,512], index: 3, kind: input, shape index: {}]   ;;  %s2676_s4 = inlined_call_operand.vmem [shape: bf16[128,128], index: 4, kind: input, shape index: {}]   ;;  %s2677_s5 = inlined_call_operand.vmem [shape: f32[1,128], index: 5, kind: input, shape index: {}]   ;;  %s2678_s6 = inlined_call_operand.vmem [shape: f32[8,128], index: 6, kind: output, shape index: {}]  }
   0x1   :  { %s1916_s23 = smov 0  }
   0x2 LB: > { %s25_s24 = sadd.s32 1, %s1866_s22  ;;  %p1625_p0 = scmp.ge.s32.totalorder %s1870_s23, 1  ;;  %s1870_s23 = sphi %s1916_s23, %s16_s23   ;;  %s1866_s22 = sphi %s1914_s22, %s2795_s22   ;;  %s1862_s21 = sphi %s1912_s21, %s2794_s21  }
   0x3   : > { %p26_p1 = scmp.ge.s32.totalorder %s25_s24, 2  ;;  %p231_p2 = scmp.lt.s32.totalorder %s1870_s23, 3 }
   0x5   : > { %s2797_s24 = smov (%p26_p1, %s25_s24), 0  ;;  %p232_p3 = pnand %p1625_p0, %p231_p2 }
   0x7   : > { %235 = sbr.rel (%p232_p3) target bundleno = 1474 (0x5c2), region = 44 }
   0xc   : > { %v1750_v0 = vld [vmem:[%s2673_s1 + $0xe4] ss:$16 sps:$4 sm:$0xff]   ;;  %v1752_v1 = vld [vmem:[%s2673_s1 + $0xec] ss:$16 sps:$4 sm:$0xff]   ;;  %v1872_v2 = vmov 0   ;;  %s1626_s19 = sshll.u32 %s1862_s21, 2  ;;  %v317_v35 = vlaneseq }
   0xd   : > { %541 = vmatprep.mubr.bf16.mxu0 %v1872_v2  ;;  %594 = vmatprep.mubr.bf16.mxu1 %v1872_v2  ;;  %v1754_v3 = vld [vmem:[%s2673_s1 + $0xe0] ss:$16 sps:$4 sm:$0xff]   ;;  %v1755_v4 = vld [vmem:[%s2673_s1 + $0xe8] ss:$16 sps:$4 sm:$0xff]   ;;  %v1756_v5 = vld [vmem:[%s2673_s1 + $0xc4] ss:$16 sps:$4 sm:$0xff]  }
   0xe   : > { %509 = vmatprep.subr.bf16.mxu0 %v1750_v0  ;;  %562 = vmatprep.subr.bf16.mxu1 %v1752_v1  ;;  %v1758_v6 = vld [vmem:[%s2673_s1 + $0xcc] ss:$16 sps:$4 sm:$0xff]   ;;  %v1760_v7 = vld [vmem:[%s2673_s1 + $0xc0] ss:$16 sps:$4 sm:$0xff]   ;;  %v1761_v8 = vld [vmem:[%s2673_s1 + $0xc8] ss:$16 sps:$4 sm:$0xff]  }
   0xf   : > { %510 = vmatpush1.bf16.msra.mxu0 %v1754_v3  ;;  %563 = vmatpush1.bf16.msra.mxu1 %v1755_v4  ;;  %v1762_v9 = vld [vmem:[%s2673_s1 + $0xa4] ss:$16 sps:$4 sm:$0xff]   ;;  %v1764_v10 = vld [vmem:[%s2673_s1 + $0xac] ss:$16 sps:$4 sm:$0xff]   ;;  %v1766_v11 = vld [vmem:[%s2673_s1 + $0xa0] ss:$16 sps:$4 sm:$0xff]  }
  0x10   : > { %511 = vmatprep.subr.bf16.mxu0 %v1756_v5  ;;  %564 = vmatprep.subr.bf16.mxu1 %v1758_v6  ;;  %v1767_v12 = vld [vmem:[%s2673_s1 + $0xa8] ss:$16 sps:$4 sm:$0xff]   ;;  %v1768_v13 = vld [vmem:[%s2673_s1 + $0x84] ss:$16 sps:$4 sm:$0xff]   ;;  %v1770_v14 = vld [vmem:[%s2673_s1 + $0x8c] ss:$16 sps:$4 sm:$0xff]  }
  0x11   : > { %p267_p4 = scmp.lt.s32.totalorder %s1626_s19, 7  ;;  %v1772_v15 = vld [vmem:[%s2673_s1 + $0x80] ss:$16 sps:$4 sm:$0xff]   ;;  %v1773_v16 = vld [vmem:[%s2673_s1 + $0x88] ss:$16 sps:$4 sm:$0xff]   ;;  %v318_v36 = vshrl.u32 %v317_v35, 7 }
  0x12   : > { %v1774_v17 = vld [vmem:[%s2673_s1 + $0x64] ss:$16 sps:$4 sm:$0xff]   ;;  %v1776_v18 = vld [vmem:[%s2673_s1 + $0x6c] ss:$16 sps:$4 sm:$0xff]   ;;  %v1778_v19 = vld [vmem:[%s2673_s1 + $0x60] ss:$16 sps:$4 sm:$0xff]  }
  0x13   : > { %512 = vmatpush1.bf16.msra.mxu0 %v1760_v7  ;;  %565 = vmatpush1.bf16.msra.mxu1 %v1761_v8  ;;  %s2799_s19 = smov (!%p267_p4, %s1626_s19), 7  ;;  %v1779_v20 = vld [vmem:[%s2673_s1 + $0x68] ss:$16 sps:$4 sm:$0xff]   ;;  %v1780_v21 = vld [vmem:[%s2673_s1 + $0x44] ss:$16 sps:$4 sm:$0xff]   ;;  %v319_v37 = vsub.s32 0, %v318_v36 }
  0x14   : > { %513 = vmatprep.subr.bf16.mxu0 %v1762_v9  ;;  %566 = vmatprep.subr.bf16.mxu1 %v1764_v10  ;;  %v1782_v22 = vld [vmem:[%s2673_s1 + $0x4c] ss:$16 sps:$4 sm:$0xff]   ;;  %s1627_s7 = sshll.u32 %s2799_s19, 2  ;;  %v1784_v23 = vld [vmem:[%s2673_s1 + $0x40] ss:$16 sps:$4 sm:$0xff]   ;;  %v327_v38 = vsub.s32 2, %v318_v36 }
  0x15   : > { %v1785_v24 = vld [vmem:[%s2673_s1 + $0x48] ss:$16 sps:$4 sm:$0xff]   ;;  %v1786_v25 = vld [vmem:[%s2673_s1 + $0x24] ss:$16 sps:$4 sm:$0xff]   ;;  %s272_s16 = scalar_lea.vmem %s2672_s0, %s1627_s7  ;;  %v1788_v26 = vld [vmem:[%s2673_s1 + $0x2c] ss:$16 sps:$4 sm:$0xff]  }
  0x16   : > { %v1790_v27 = vld [vmem:[%s2673_s1 + $0x20] ss:$16 sps:$4 sm:$0xff]   ;;  %v1791_v28 = vld [vmem:[%s2673_s1 + $0x28] ss:$16 sps:$4 sm:$0xff]   ;;  %v1792_v29 = vld [vmem:[%s2673_s1 + $0x4] ss:$16 sps:$4 sm:$0xff]  }
  0x17   : > { %514 = vmatpush1.bf16.msra.mxu0 %v1766_v11  ;;  %567 = vmatpush1.bf16.msra.mxu1 %v1767_v12  ;;  %v1794_v30 = vld [vmem:[%s2673_s1 + $0xc] ss:$16 sps:$4 sm:$0xff]   ;;  %v1796_v31 = vld [vmem:[%s2673_s1] ss:$16 sps:$4 sm:$0xff]   ;;  %v1797_v32 = vld [vmem:[%s2673_s1 + $0x8] ss:$16 sps:$4 sm:$0xff]  }
  0x18   : > { %515 = vmatprep.subr.bf16.mxu0 %v1768_v13  ;;  %568 = vmatprep.subr.bf16.mxu1 %v1770_v14  ;;  %v1798_v33 = vld [vmem:[%s272_s16] sm:$0xff]   ;;  %v1799_v34 = vld [vmem:[%s272_s16 + $0x8] sm:$0xff]   ;;  %v323_v39 = vsub.s32 1, %v318_v36  ;;  %v331_v40 = vsub.s32 3, %v318_v36  ;;  %p1670_p5 = scmp.ne.s32.totalorder %s1862_s21, 0 }
  0x19   : > { %v315_v41 = vld [vmem:[%s2675_s3] sm:$0xf] }
  0x1a   : > { %v320_v42 = vrot.slane %v315_v41, %v319_v37  ;;  %v328_v43 = vrot.slane %v315_v41, %v327_v38  ;;  %v324_v44 = vrot.slane %v315_v41, %v323_v39  ;;  %v332_v45 = vrot.slane %v315_v41, %v331_v40 }
  0x1b   : > { %516 = vmatpush1.bf16.msra.mxu0 %v1772_v15  ;;  %569 = vmatpush1.bf16.msra.mxu1 %v1773_v16 }
  0x1c   : > { %517 = vmatprep.subr.bf16.mxu0 %v1774_v17  ;;  %570 = vmatprep.subr.bf16.mxu1 %v1776_v18 }
  0x1f   : > { %518 = vmatpush1.bf16.msra.mxu0 %v1778_v19  ;;  %571 = vmatpush1.bf16.msra.mxu1 %v1779_v20 }
  0x20   : > { %519 = vmatprep.subr.bf16.mxu0 %v1780_v21  ;;  %572 = vmatprep.subr.bf16.mxu1 %v1782_v22 }
  0x23   : > { %520 = vmatpush1.bf16.msra.mxu0 %v1784_v23  ;;  %573 = vmatpush1.bf16.msra.mxu1 %v1785_v24 }
  0x24   : > { %521 = vmatprep.subr.bf16.mxu0 %v1786_v25  ;;  %574 = vmatprep.subr.bf16.mxu1 %v1788_v26 }
  0x27   : > { %522 = vmatpush1.bf16.msra.mxu0 %v1790_v27  ;;  %575 = vmatpush1.bf16.msra.mxu1 %v1791_v28 }
  0x28   : > { %523 = vmatprep.subr.bf16.mxu0 %v1792_v29  ;;  %576 = vmatprep.subr.bf16.mxu1 %v1794_v30 }
  0x2b   : > { %524 = vmatpush1.bf16.msra.mxu0 %v1796_v31  ;;  %577 = vmatpush1.bf16.msra.mxu1 %v1797_v32 }
  0x2e   : > { %542 = vmatmul.mubr.bf16.vlgmr.msra.gmra.mxu0 %v1798_v33  ;;  %595 = vmatmul.mubr.bf16.vlgmr.msra.gmra.mxu1 %v1798_v33 }
  0x2f   : > { %551 = vmatprep.mubr.bf16.mxu0 %v1872_v2  ;;  %604 = vmatprep.mubr.bf16.mxu1 %v1872_v2 }
  0x36   : > { %552 = vmatmul.mubr.bf16.gmra.mxu0 %v1799_v34  ;;  %605 = vmatmul.mubr.bf16.gmra.mxu1 %v1799_v34 }
  0xee   : > { %v543_v46 = vpop.f32.mrf.mxu0  ;;  %v596_v47 = vpop.f32.mrf.mxu1 }
  0xef   : > { %v544_v50 = vadd.f32 %v543_v46, %v320_v42  ;;  %v597_v51 = vadd.f32 %v596_v47, %v328_v43 }
  0xf0   : > { %v545_v48 = vpop.f32.mrf.mxu0  ;;  %v598_v49 = vpop.f32.mrf.mxu1 }
  0xf1   : > { %v546_v52 = vadd.f32 %v545_v48, %v324_v44  ;;  %v599_v53 = vadd.f32 %v598_v49, %v332_v45 }
  0xf2   : > { %v547_v54 = vpop.f32.mrf.mxu0  ;;  %v600_v55 = vpop.f32.mrf.mxu1 }
  0xf3   : > { %v1684_v56 = vpack.c.bf16 %v546_v52, %v544_v50  ;;  %v1685_v57 = vpack.c.bf16 %v599_v53, %v597_v51  ;;  %v548_v60 = vadd.f32 %v547_v54, %v320_v42  ;;  %v601_v61 = vadd.f32 %v600_v55, %v328_v43 }
  0xf4   : > { %v549_v58 = vpop.f32.mrf.mxu0  ;;  %v602_v59 = vpop.f32.mrf.mxu1 }
  0xf5   : > { %663 = vst [vmem:[#allocation2 + $0x30] sm:$0xff] %v1684_v56  ;;  %664 = vst [vmem:[#allocation2] sm:$0xff] %v1685_v57  ;;  %v550_v62 = vadd.f32 %v549_v58, %v324_v44  ;;  %v603_v63 = vadd.f32 %v602_v59, %v332_v45 }
  0xf6   : > { %v553_v0 = vpop.f32.mrf.mxu0  ;;  %v606_v1 = vpop.f32.mrf.mxu1 }
  0xf7   : > { %v1686_v2 = vpack.c.bf16 %v550_v62, %v548_v60  ;;  %v1687_v3 = vpack.c.bf16 %v603_v63, %v601_v61  ;;  %v554_v6 = vadd.f32 %v553_v0, %v320_v42  ;;  %v607_v7 = vadd.f32 %v606_v1, %v328_v43 }
  0xf8   : > { %v555_v4 = vpop.f32.mrf.mxu0  ;;  %v608_v5 = vpop.f32.mrf.mxu1 }
  0xf9   : > { %665 = vst [vmem:[#allocation2 + $0x18] sm:$0xff] %v1686_v2  ;;  %666 = vst [vmem:[#allocation2 + $0x10] sm:$0xff] %v1687_v3  ;;  %v556_v8 = vadd.f32 %v555_v4, %v324_v44  ;;  %v609_v9 = vadd.f32 %v608_v5, %v332_v45 }
  0xfa   : > { %v557_v10 = vpop.f32.mrf.mxu0  ;;  %v610_v11 = vpop.f32.mrf.mxu1 }
  0xfb   : > { %v1688_v12 = vpack.c.bf16 %v556_v8, %v554_v6  ;;  %v1689_v13 = vpack.c.bf16 %v609_v9, %v607_v7  ;;  %v558_v16 = vadd.f32 %v557_v10, %v320_v42  ;;  %v611_v17 = vadd.f32 %v610_v11, %v328_v43 }
  0xfc   : > { %v559_v14 = vpop.f32.mrf.mxu0  ;;  %v612_v15 = vpop.f32.mrf.mxu1 }
  0xfd   : > { %667 = vst [vmem:[#allocation2 + $0x8] sm:$0xff] %v1688_v12  ;;  %668 = vst [vmem:[#allocation2 + $0x20] sm:$0xff] %v1689_v13  ;;  %v560_v18 = vadd.f32 %v559_v14, %v324_v44  ;;  %v613_v19 = vadd.f32 %v612_v15, %v332_v45  ;;  %674 = sbr.rel (%p1670_p5) target bundleno = 260 (0x104), region = 48 }
  0xff   : > { %v1690_v20 = vpack.c.bf16 %v560_v18, %v558_v16  ;;  %v1691_v21 = vpack.c.bf16 %v613_v19, %v611_v17 }
 0x101   : > { %669 = vst [vmem:[#allocation2 + $0x28] sm:$0xff] %v1690_v20  ;;  %670 = vst [vmem:[#allocation2 + $0x38] sm:$0xff] %v1691_v21 }
 0x102   : > { %v1873_v22 = vmov 0.0  }
 0x103   : > { %675 = vst [vmem:[#allocation3] sm:$0xff] %v1873_v22  ;;  %676 = vst [vmem:[#allocation4] sm:$0xff] %v1873_v22 }
 0x104 PF: > { %v2043_v23 = vld [vmem:[%s2674_s2 + $0x1e8] sm:$0xff]  ;;  %v2048_v24 = vld [vmem:[%s2674_s2 + $0x1e0] sm:$0xff]  ;;  %v2064_v27 = vld [vmem:[%s2674_s2 + $0x1f8] sm:$0xff]  ;;  %v2679_v28 = vmov 0.0   ;;  %p1671_p6 = scmp.ne.s32.totalorder %s1862_s21, 1 }
 0x105   : > { %2725 = vst [vmem:[#allocation5_spill] sm:$0xff] %v2043_v23  ;;  %v2053_v25 = vld [vmem:[%s2674_s2 + $0x1c8] sm:$0xff]  ;;  %752 = vmatprep.subr.mxu0 %v2043_v23  ;;  %v2059_v26 = vld [vmem:[%s2674_s2 + $0x1c0] sm:$0xff]  ;;  %2726 = vst [vmem:[#allocation6_spill] sm:$0xff] %v2064_v27  ;;  %816 = vmatprep.mubr.f32.mxu0 %v2679_v28 }
 0x106   : > { %753 = vmatpush1.msra.mxu0 %v2048_v24  ;;  %v2071_v29 = vld [vmem:[%s2674_s2 + $0x1a8] sm:$0xff]  ;;  %823 = vmatprep.subr.mxu1 %v2064_v27  ;;  %v2077_v30 = vld [vmem:[%s2674_s2 + $0x1f0] sm:$0xff]  ;;  %v2083_v31 = vld [vmem:[%s2674_s2 + $0x1a0] sm:$0xff] }
 0x107   : > { %754 = vmatprep.subr.mxu0 %v2053_v25  ;;  %824 = vmatpush1.msra.mxu1 %v2077_v30  ;;  %v2089_v32 = vld [vmem:[%s2674_s2 + $0x1d8] sm:$0xff]  ;;  %v2094_v33 = vld [vmem:[%s2674_s2 + $0x1d0] sm:$0xff]  ;;  %v2100_v34 = vld [vmem:[%s2674_s2 + $0x188] sm:$0xff] }
 0x108   : > { %755 = vmatpush1.msra.mxu0 %v2059_v26  ;;  %825 = vmatprep.subr.mxu1 %v2089_v32  ;;  %v2106_v35 = vld [vmem:[%s2674_s2 + $0x1b8] sm:$0xff]  ;;  %v2112_v36 = vld [vmem:[%s2674_s2 + $0x180] sm:$0xff]  ;;  %v2118_v37 = vld [vmem:[%s2674_s2 + $0x1b0] sm:$0xff] }
 0x109   : > { %756 = vmatprep.subr.mxu0 %v2071_v29  ;;  %826 = vmatpush1.msra.mxu1 %v2094_v33  ;;  %v2123_v38 = vld [vmem:[%s2674_s2 + $0x198] sm:$0xff]  ;;  %v2129_v39 = vld [vmem:[%s2674_s2 + $0x168] sm:$0xff]  ;;  %v2135_v40 = vld [vmem:[%s2674_s2 + $0x190] sm:$0xff] }
 0x10a   : > { %757 = vmatpush1.msra.mxu0 %v2083_v31  ;;  %827 = vmatprep.subr.mxu1 %v2106_v35  ;;  %v2141_v41 = vld [vmem:[%s2674_s2 + $0x160] sm:$0xff]  ;;  %v2147_v42 = vld [vmem:[%s2674_s2 + $0x178] sm:$0xff]  ;;  %v2153_v43 = vld [vmem:[%s2674_s2 + $0x148] sm:$0xff] }
 0x10b   : > { %758 = vmatprep.subr.mxu0 %v2100_v34  ;;  %828 = vmatpush1.msra.mxu1 %v2118_v37  ;;  %v2159_v44 = vld [vmem:[%s2674_s2 + $0x170] sm:$0xff]  ;;  %v2165_v45 = vld [vmem:[%s2674_s2 + $0x140] sm:$0xff]  ;;  %v2171_v46 = vld [vmem:[%s2674_s2 + $0x158] sm:$0xff] }
 0x10c   : > { %759 = vmatpush1.msra.mxu0 %v2112_v36  ;;  %829 = vmatprep.subr.mxu1 %v2123_v38  ;;  %v2177_v47 = vld [vmem:[%s2674_s2 + $0x128] sm:$0xff]  ;;  %v2183_v48 = vld [vmem:[%s2674_s2 + $0x150] sm:$0xff]  ;;  %v2189_v49 = vld [vmem:[%s2674_s2 + $0x120] sm:$0xff] }
 0x10d   : > { %760 = vmatprep.subr.mxu0 %v2129_v39  ;;  %830 = vmatpush1.msra.mxu1 %v2135_v40  ;;  %v2195_v50 = vld [vmem:[%s2674_s2 + $0x138] sm:$0xff]  ;;  %v2201_v51 = vld [vmem:[%s2674_s2 + $0x108] sm:$0xff]  ;;  %v2207_v52 = vld [vmem:[%s2674_s2 + $0x130] sm:$0xff] }
 0x10e   : > { %761 = vmatpush1.msra.mxu0 %v2141_v41  ;;  %831 = vmatprep.subr.mxu1 %v2147_v42  ;;  %v2213_v53 = vld [vmem:[%s2674_s2 + $0x100] sm:$0xff]  ;;  %v2219_v54 = vld [vmem:[%s2674_s2 + $0x118] sm:$0xff]  ;;  %v2225_v55 = vld [vmem:[%s2674_s2 + $0xe8] sm:$0xff] }
 0x10f   : > { %762 = vmatprep.subr.mxu0 %v2153_v43  ;;  %832 = vmatpush1.msra.mxu1 %v2159_v44  ;;  %v2231_v56 = vld [vmem:[%s2674_s2 + $0x110] sm:$0xff]  ;;  %v2237_v57 = vld [vmem:[%s2674_s2 + $0xe0] sm:$0xff]  ;;  %v2243_v58 = vld [vmem:[%s2674_s2 + $0xf8] sm:$0xff] }
 0x110   : > { %763 = vmatpush1.msra.mxu0 %v2165_v45  ;;  %833 = vmatprep.subr.mxu1 %v2171_v46  ;;  %v2249_v59 = vld [vmem:[%s2674_s2 + $0xc8] sm:$0xff]  ;;  %v2255_v60 = vld [vmem:[%s2674_s2 + $0xf0] sm:$0xff]  ;;  %v2261_v61 = vld [vmem:[%s2674_s2 + $0xc0] sm:$0xff] }
 0x111   : > { %764 = vmatprep.subr.mxu0 %v2177_v47  ;;  %834 = vmatpush1.msra.mxu1 %v2183_v48  ;;  %v2267_v62 = vld [vmem:[%s2674_s2 + $0xd8] sm:$0xff]  ;;  %v2273_v63 = vld [vmem:[%s2674_s2 + $0xa8] sm:$0xff]  ;;  %v2279_v0 = vld [vmem:[%s2674_s2 + $0xd0] sm:$0xff] }
 0x112   : > { %765 = vmatpush1.msra.mxu0 %v2189_v49  ;;  %835 = vmatprep.subr.mxu1 %v2195_v50  ;;  %v2285_v1 = vld [vmem:[%s2674_s2 + $0xa0] sm:$0xff]  ;;  %v2291_v2 = vld [vmem:[%s2674_s2 + $0xb8] sm:$0xff]  ;;  %v2297_v3 = vld [vmem:[%s2674_s2 + $0x88] sm:$0xff] }
 0x113   : > { %766 = vmatprep.subr.mxu0 %v2201_v51  ;;  %836 = vmatpush1.msra.mxu1 %v2207_v52  ;;  %2727 = vst [vmem:[#allocation7_spill] sm:$0xff] %v2297_v3  ;;  %v2303_v4 = vld [vmem:[%s2674_s2 + $0xb0] sm:$0xff]  ;;  %v2309_v5 = vld [vmem:[%s2674_s2 + $0x80] sm:$0xff]  ;;  %v2315_v6 = vld [vmem:[%s2674_s2 + $0x98] sm:$0xff] }
 0x114   : > { %767 = vmatpush1.msra.mxu0 %v2213_v53  ;;  %837 = vmatprep.subr.mxu1 %v2219_v54  ;;  %2728 = vst [vmem:[#allocation8_spill] sm:$0xff] %v2309_v5  ;;  %2729 = vst [vmem:[#allocation9_spill] sm:$0xff] %v2315_v6  ;;  %v2321_v7 = vld [vmem:[%s2674_s2 + $0x68] sm:$0xff]  ;;  %v2327_v8 = vld [vmem:[%s2674_s2 + $0x90] sm:$0xff] }
 0x115   : > { %768 = vmatprep.subr.mxu0 %v2225_v55  ;;  %838 = vmatpush1.msra.mxu1 %v2231_v56  ;;  %2730 = vst [vmem:[#allocation10_spill] sm:$0xff] %v2321_v7  ;;  %2731 = vst [vmem:[#allocation11_spill] sm:$0xff] %v2327_v8  ;;  %v2333_v9 = vld [vmem:[%s2674_s2 + $0x60] sm:$0xff]  ;;  %v2339_v10 = vld [vmem:[%s2674_s2 + $0x78] sm:$0xff] }
 0x116   : > { %769 = vmatpush1.msra.mxu0 %v2237_v57  ;;  %839 = vmatprep.subr.mxu1 %v2243_v58  ;;  %2732 = vst [vmem:[#allocation12_spill] sm:$0xff] %v2333_v9  ;;  %2733 = vst [vmem:[#allocation13_spill] sm:$0xff] %v2339_v10  ;;  %v2345_v11 = vld [vmem:[%s2674_s2 + $0x48] sm:$0xff]  ;;  %v2351_v12 = vld [vmem:[%s2674_s2 + $0x70] sm:$0xff] }
 0x117   : > { %770 = vmatprep.subr.mxu0 %v2249_v59  ;;  %840 = vmatpush1.msra.mxu1 %v2255_v60  ;;  %2734 = vst [vmem:[#allocation14_spill] sm:$0xff] %v2345_v11  ;;  %2735 = vst [vmem:[#allocation15_spill] sm:$0xff] %v2351_v12  ;;  %v2357_v13 = vld [vmem:[%s2674_s2 + $0x40] sm:$0xff]  ;;  %v2363_v14 = vld [vmem:[%s2674_s2 + $0x58] sm:$0xff] }
 0x118   : > { %771 = vmatpush1.msra.mxu0 %v2261_v61  ;;  %841 = vmatprep.subr.mxu1 %v2267_v62  ;;  %2736 = vst [vmem:[#allocation16_spill] sm:$0xff] %v2357_v13  ;;  %2737 = vst [vmem:[#allocation17_spill] sm:$0xff] %v2363_v14  ;;  %v2369_v15 = vld [vmem:[%s2674_s2 + $0x28] sm:$0xff]  ;;  %v2375_v16 = vld [vmem:[%s2674_s2 + $0x50] sm:$0xff] }
 0x119   : > { %772 = vmatprep.subr.mxu0 %v2273_v63  ;;  %842 = vmatpush1.msra.mxu1 %v2279_v0  ;;  %2738 = vst [vmem:[#allocation18_spill] sm:$0xff] %v2369_v15  ;;  %2739 = vst [vmem:[#allocation19_spill] sm:$0xff] %v2375_v16  ;;  %v2381_v17 = vld [vmem:[%s2674_s2 + $0x20] sm:$0xff]  ;;  %v2387_v18 = vld [vmem:[%s2674_s2 + $0x38] sm:$0xff] }
 0x11a   : > { %773 = vmatpush1.msra.mxu0 %v2285_v1  ;;  %843 = vmatprep.subr.mxu1 %v2291_v2  ;;  %2740 = vst [vmem:[#allocation20_spill] sm:$0xff] %v2381_v17  ;;  %2741 = vst [vmem:[#allocation21_spill] sm:$0xff] %v2387_v18  ;;  %v2393_v19 = vld [vmem:[%s2674_s2 + $0x8] sm:$0xff]  ;;  %v2399_v20 = vld [vmem:[%s2674_s2 + $0x30] sm:$0xff] }
 0x11b   : > { %774 = vmatprep.subr.mxu0 %v2297_v3  ;;  %844 = vmatpush1.msra.mxu1 %v2303_v4  ;;  %2742 = vst [vmem:[#allocation22_spill] sm:$0xff] %v2393_v19  ;;  %2743 = vst [vmem:[#allocation23_spill] sm:$0xff] %v2399_v20  ;;  %v2405_v21 = vld [vmem:[%s2674_s2] sm:$0xff]  ;;  %v2411_v22 = vld [vmem:[%s2674_s2 + $0x18] sm:$0xff] }
 0x11c   : > { %775 = vmatpush1.msra.mxu0 %v2309_v5  ;;  %845 = vmatprep.subr.mxu1 %v2315_v6  ;;  %2744 = vst [vmem:[#allocation24_spill] sm:$0xff] %v2405_v21  ;;  %2745 = vst [vmem:[#allocation25_spill] sm:$0xff] %v2411_v22  ;;  %v677_v28 = vld [vmem:[#allocation3] sm:$0xff] }
 0x11d   : > { %776 = vmatprep.subr.mxu0 %v2321_v7  ;;  %846 = vmatpush1.msra.mxu1 %v2327_v8 }
 0x11e   : > { %777 = vmatpush1.msra.mxu0 %v2333_v9  ;;  %847 = vmatprep.subr.mxu1 %v2339_v10 }
 0x11f   : > { %778 = vmatprep.subr.mxu0 %v2345_v11  ;;  %848 = vmatpush1.msra.mxu1 %v2351_v12 }
 0x120   : > { %779 = vmatpush1.msra.mxu0 %v2357_v13  ;;  %849 = vmatprep.subr.mxu1 %v2363_v14 }
 0x121   : > { %780 = vmatprep.subr.mxu0 %v2369_v15  ;;  %850 = vmatpush1.msra.mxu1 %v2375_v16  ;;  %v2418_v15 = vld [vmem:[%s2674_s2 + $0x10] sm:$0xff] }
 0x122   : > { %781 = vmatpush1.msra.mxu0 %v2381_v17  ;;  %851 = vmatprep.subr.mxu1 %v2387_v18  ;;  %2746 = vst [vmem:[#allocation26_spill] sm:$0xff] %v2418_v15  ;;  %v2747_v17 = vmov 0.0  }
 0x123   : > { %782 = vmatprep.subr.mxu0 %v2393_v19  ;;  %852 = vmatpush1.msra.mxu1 %v2399_v20 }
 0x124   : > { %783 = vmatpush1.msra.mxu0 %v2405_v21  ;;  %853 = vmatprep.subr.mxu1 %v2411_v22 }
 0x125   : > { %817 = vmatmul.mubr.f32.vlgmr.msra.gmra.mxu0 %v677_v28  ;;  %854 = vmatpush1.msra.mxu1 %v2418_v15 }
 0x126   : > { %887 = vmatprep.mubr.f32.mxu1 %v2747_v17  ;;  %925 = vmatprep.subr.mxu0 %v2043_v23 }
 0x127   : > { %888 = vmatmul.mubr.f32.vlgmr.msra.gmra.mxu1 %v677_v28  ;;  %996 = vmatprep.subr.mxu1 %v2064_v27  ;;  %v2748_v28 = vld [vmem:[#allocation18_spill] sm:$0xff] }
 0x128   : > { %926 = vmatpush1.msra.mxu0 %v2048_v24  ;;  %997 = vmatpush1.msra.mxu1 %v2077_v30 }
 0x129   : > { %927 = vmatprep.subr.mxu0 %v2053_v25  ;;  %998 = vmatprep.subr.mxu1 %v2089_v32 }
 0x12a   : > { %928 = vmatpush1.msra.mxu0 %v2059_v26  ;;  %999 = vmatpush1.msra.mxu1 %v2094_v33 }
 0x12b   : > { %929 = vmatprep.subr.mxu0 %v2071_v29  ;;  %1000 = vmatprep.subr.mxu1 %v2106_v35 }
 0x12c   : > { %930 = vmatpush1.msra.mxu0 %v2083_v31  ;;  %1001 = vmatpush1.msra.mxu1 %v2118_v37 }
 0x12d   : > { %931 = vmatprep.subr.mxu0 %v2100_v34  ;;  %1002 = vmatprep.subr.mxu1 %v2123_v38 }
 0x12e   : > { %932 = vmatpush1.msra.mxu0 %v2112_v36  ;;  %1003 = vmatpush1.msra.mxu1 %v2135_v40 }
 0x12f   : > { %933 = vmatprep.subr.mxu0 %v2129_v39  ;;  %1004 = vmatprep.subr.mxu1 %v2147_v42 }
 0x130   : > { %934 = vmatpush1.msra.mxu0 %v2141_v41  ;;  %1005 = vmatpush1.msra.mxu1 %v2159_v44 }
 0x131   : > { %935 = vmatprep.subr.mxu0 %v2153_v43  ;;  %1006 = vmatprep.subr.mxu1 %v2171_v46 }
 0x132   : > { %936 = vmatpush1.msra.mxu0 %v2165_v45  ;;  %1007 = vmatpush1.msra.mxu1 %v2183_v48 }
 0x133   : > { %937 = vmatprep.subr.mxu0 %v2177_v47  ;;  %1008 = vmatprep.subr.mxu1 %v2195_v50 }
 0x134   : > { %938 = vmatpush1.msra.mxu0 %v2189_v49  ;;  %1009 = vmatpush1.msra.mxu1 %v2207_v52 }
 0x135   : > { %939 = vmatprep.subr.mxu0 %v2201_v51  ;;  %1010 = vmatprep.subr.mxu1 %v2219_v54 }
 0x136   : > { %940 = vmatpush1.msra.mxu0 %v2213_v53  ;;  %1011 = vmatpush1.msra.mxu1 %v2231_v56 }
 0x137   : > { %941 = vmatprep.subr.mxu0 %v2225_v55  ;;  %1012 = vmatprep.subr.mxu1 %v2243_v58 }
 0x138   : > { %942 = vmatpush1.msra.mxu0 %v2237_v57  ;;  %1013 = vmatpush1.msra.mxu1 %v2255_v60 }
 0x139   : > { %943 = vmatprep.subr.mxu0 %v2249_v59  ;;  %1014 = vmatprep.subr.mxu1 %v2267_v62 }
 0x13a   : > { %944 = vmatpush1.msra.mxu0 %v2261_v61  ;;  %1015 = vmatpush1.msra.mxu1 %v2279_v0 }
 0x13b   : > { %945 = vmatprep.subr.mxu0 %v2273_v63  ;;  %1016 = vmatprep.subr.mxu1 %v2291_v2 }
 0x13c   : > { %946 = vmatpush1.msra.mxu0 %v2285_v1  ;;  %1017 = vmatpush1.msra.mxu1 %v2303_v4 }
 0x13d   : > { %947 = vmatprep.subr.mxu0 %v2297_v3  ;;  %1018 = vmatprep.subr.mxu1 %v2315_v6 }
 0x13e   : > { %948 = vmatpush1.msra.mxu0 %v2309_v5  ;;  %1019 = vmatpush1.msra.mxu1 %v2327_v8  ;;  %v2749_v8 = vld [vmem:[#allocation20_spill] sm:$0xff] }
 0x13f   : > { %949 = vmatprep.subr.mxu0 %v2321_v7  ;;  %1020 = vmatprep.subr.mxu1 %v2339_v10 }
 0x140   : > { %950 = vmatpush1.msra.mxu0 %v2333_v9  ;;  %1021 = vmatpush1.msra.mxu1 %v2351_v12 }
 0x141   : > { %951 = vmatprep.subr.mxu0 %v2345_v11  ;;  %1022 = vmatprep.subr.mxu1 %v2363_v14 }
 0x142   : > { %952 = vmatpush1.msra.mxu0 %v2357_v13  ;;  %1023 = vmatpush1.msra.mxu1 %v2375_v16 }
 0x143   : > { %953 = vmatprep.subr.mxu0 %v2748_v28  ;;  %1024 = vmatprep.subr.mxu1 %v2387_v18  ;;  %v682_v18 = vld [vmem:[#allocation2 + $0x30] sm:$0xff]  ;;  %v683_v28 = vld [vmem:[#allocation2] sm:$0xff] }
 0x144   : > { %954 = vmatpush1.msra.mxu0 %v2749_v8  ;;  %1025 = vmatpush1.msra.mxu1 %v2399_v20  ;;  %v684_v8 = vunpack.c.l.bf16 %v682_v18  ;;  %v685_v20 = vunpack.c.h.bf16 %v682_v18  ;;  %v687_v13 = vunpack.c.h.bf16 %v683_v28 }
 0x145   : > { %955 = vmatprep.subr.mxu0 %v2393_v19  ;;  %1026 = vmatprep.subr.mxu1 %v2411_v22 }
 0x146   : > { %956 = vmatpush1.msra.mxu0 %v2405_v21  ;;  %989 = vmatprep.mubr.f32.mxu0 %v2747_v17 }
 0x147   : > { %1027 = vmatpush1.msra.mxu1 %v2418_v15  ;;  %1060 = vmatprep.mubr.f32.mxu1 %v2747_v17  ;;  %v686_v17 = vunpack.c.l.bf16 %v683_v28  ;;  %v2760_v28 = vld [vmem:[#allocation16_spill] sm:$0xff] }
 0x148   : > { %1098 = vmatprep.subr.mxu0 %v2043_v23  ;;  %1169 = vmatprep.subr.mxu1 %v2064_v27 }
 0x1e5   : > { %v818_v16 = vpop.f32.mrf.mxu0 }
 0x1e6   : > { %v894_v19 = vadd.f32 %v818_v16, %v684_v8  ;;  %v678_v16 = vld [vmem:[#allocation4] sm:$0xff] }
 0x1e7   : > { %v820_v22 = vpop.f32.mrf.mxu0  ;;  %v889_v14 = vpop.f32.mrf.mxu1 }
 0x1e8   : > { %v898_v21 = vmul.f32 0.5, %v894_v19  ;;  %v895_v11 = vadd.f32 %v820_v22, %v685_v20  ;;  %v896_v23 = vadd.f32 %v889_v14, %v686_v17  ;;  %v2756_v14 = vld [vmem:[#allocation12_spill] sm:$0xff]  ;;  %v2758_v17 = vld [vmem:[#allocation14_spill] sm:$0xff] }
 0x1e9   : > { %v891_v12 = vpop.f32.mrf.mxu1 }
 0x1ea   : > { %1800 = vtanh.f32 %v898_v21  ;;  %v899_v15 = vmul.f32 0.5, %v895_v11  ;;  %v897_v9 = vadd.f32 %v891_v12, %v687_v13  ;;  %v900_v27 = vmul.f32 0.5, %v896_v23  ;;  %v2759_v21 = vld [vmem:[#allocation17_spill] sm:$0xff] }
 0x1ec   : > { %1802 = vtanh.f32 %v899_v15  ;;  %v2757_v15 = vld [vmem:[#allocation15_spill] sm:$0xff] }
 0x1ed   : > { %1804 = vtanh.f32 %v897_v9 }
 0x1ee   : > { %1806 = vtanh.f32 %v900_v27  ;;  %v2750_v27 = vld [vmem:[#allocation7_spill] sm:$0xff] }
 0x1f7   : > { %v1801_v10 = vpop.eup %1800 }
 0x1f8   : > { %v904_v7 = vmul.f32 0.5, %v1801_v10  ;;  %v2755_v10 = vld [vmem:[#allocation13_spill] sm:$0xff] }
 0x1f9   : > { %v1803_v5 = vpop.eup %1802 }
 0x1fa   : > { %v907_v18 = vadd.f32 0.5, %v904_v7  ;;  %v905_v6 = vmul.f32 0.5, %v1803_v5  ;;  %v1805_v8 = vpop.eup %1804  ;;  %v2752_v5 = vld [vmem:[#allocation8_spill] sm:$0xff]  ;;  %v2754_v7 = vld [vmem:[#allocation10_spill] sm:$0xff] }
 0x1fb   : > { %v1807_v11 = vpop.eup %1806 }
 0x1fc   : > { %v908_v3 = vadd.f32 0.5, %v905_v6  ;;  %v912_v20 = vmul.f32 %v1805_v8, %v907_v18  ;;  %v906_v12 = vmul.f32 0.5, %v1807_v11  ;;  %v2753_v6 = vld [vmem:[#allocation11_spill] sm:$0xff]  ;;  %v2762_v8 = vld [vmem:[#allocation18_spill] sm:$0xff] }
 0x1fd   : > { %v2761_v18 = vld [vmem:[#allocation19_spill] sm:$0xff]  ;;  %v2766_v11 = vld [vmem:[#allocation22_spill] sm:$0xff] }
 0x1fe   : > { %v911_v19 = vmul.f32 %v908_v3, %v678_v16  ;;  %v909_v9 = vadd.f32 0.5, %v906_v12  ;;  %v2751_v3 = vld [vmem:[#allocation9_spill] sm:$0xff] }
 0x1ff   : > { %v2763_v16 = vld [vmem:[#allocation21_spill] sm:$0xff] }
 0x200   : > { %v2494_v22 = vadd.f32 %v912_v20, %v911_v19  ;;  %v2764_v19 = vld [vmem:[#allocation20_spill] sm:$0xff]  ;;  %v2765_v20 = vld [vmem:[#allocation23_spill] sm:$0xff]  ;;  %v2767_v12 = vld [vmem:[#allocation25_spill] sm:$0xff] }
 0x202   : > { %1808 = vtanh.f32 %v2494_v22 }
 0x20f   : > { %v1809_v13 = vpop.eup %1808 }
 0x210   : > { %v915_v23 = vmul.f32 %v1809_v13, %v909_v9  ;;  %v2768_v9 = vld [vmem:[#allocation24_spill] sm:$0xff]  ;;  %v2769_v13 = vmov 0.0  }
 0x212   : > { %990 = vmatmul.mubr.f32.vlgmr.msra.gmra.mxu0 %v915_v23  ;;  %1061 = vmatmul.mubr.f32.vlgmr.msra.gmra.mxu1 %v915_v23  ;;  %v2770_v23 = vld [vmem:[#allocation26_spill] sm:$0xff] }
 0x213   : > { %1099 = vmatpush1.msra.mxu0 %v2048_v24  ;;  %1170 = vmatpush1.msra.mxu1 %v2077_v30 }
 0x214   : > { %1100 = vmatprep.subr.mxu0 %v2053_v25  ;;  %1171 = vmatprep.subr.mxu1 %v2089_v32 }
 0x215   : > { %1101 = vmatpush1.msra.mxu0 %v2059_v26  ;;  %1172 = vmatpush1.msra.mxu1 %v2094_v33 }
 0x216   : > { %1102 = vmatprep.subr.mxu0 %v2071_v29  ;;  %1173 = vmatprep.subr.mxu1 %v2106_v35 }
 0x217   : > { %1103 = vmatpush1.msra.mxu0 %v2083_v31  ;;  %1174 = vmatpush1.msra.mxu1 %v2118_v37 }
 0x218   : > { %1104 = vmatprep.subr.mxu0 %v2100_v34  ;;  %1175 = vmatprep.subr.mxu1 %v2123_v38 }
 0x219   : > { %1105 = vmatpush1.msra.mxu0 %v2112_v36  ;;  %1176 = vmatpush1.msra.mxu1 %v2135_v40 }
 0x21a   : > { %1106 = vmatprep.subr.mxu0 %v2129_v39  ;;  %1177 = vmatprep.subr.mxu1 %v2147_v42 }
 0x21b   : > { %1107 = vmatpush1.msra.mxu0 %v2141_v41  ;;  %1178 = vmatpush1.msra.mxu1 %v2159_v44 }
 0x21c   : > { %1108 = vmatprep.subr.mxu0 %v2153_v43  ;;  %1179 = vmatprep.subr.mxu1 %v2171_v46 }
 0x21d   : > { %1109 = vmatpush1.msra.mxu0 %v2165_v45  ;;  %1180 = vmatpush1.msra.mxu1 %v2183_v48 }
 0x21e   : > { %1110 = vmatprep.subr.mxu0 %v2177_v47  ;;  %1181 = vmatprep.subr.mxu1 %v2195_v50 }
 0x21f   : > { %1111 = vmatpush1.msra.mxu0 %v2189_v49  ;;  %1182 = vmatpush1.msra.mxu1 %v2207_v52 }
 0x220   : > { %1112 = vmatprep.subr.mxu0 %v2201_v51  ;;  %1183 = vmatprep.subr.mxu1 %v2219_v54 }
 0x221   : > { %1113 = vmatpush1.msra.mxu0 %v2213_v53  ;;  %1184 = vmatpush1.msra.mxu1 %v2231_v56 }
 0x222   : > { %1114 = vmatprep.subr.mxu0 %v2225_v55  ;;  %1185 = vmatprep.subr.mxu1 %v2243_v58 }
 0x223   : > { %1115 = vmatpush1.msra.mxu0 %v2237_v57  ;;  %1186 = vmatpush1.msra.mxu1 %v2255_v60 }
 0x224   : > { %1116 = vmatprep.subr.mxu0 %v2249_v59  ;;  %1187 = vmatprep.subr.mxu1 %v2267_v62 }
 0x225   : > { %1117 = vmatpush1.msra.mxu0 %v2261_v61  ;;  %1188 = vmatpush1.msra.mxu1 %v2279_v0 }
 0x226   : > { %1118 = vmatprep.subr.mxu0 %v2273_v63  ;;  %1189 = vmatprep.subr.mxu1 %v2291_v2 }
 0x227   : > { %1119 = vmatpush1.msra.mxu0 %v2285_v1  ;;  %1190 = vmatpush1.msra.mxu1 %v2303_v4 }
 0x228   : > { %1120 = vmatprep.subr.mxu0 %v2750_v27  ;;  %1191 = vmatprep.subr.mxu1 %v2751_v3 }
 0x229   : > { %1121 = vmatpush1.msra.mxu0 %v2752_v5  ;;  %1192 = vmatpush1.msra.mxu1 %v2753_v6 }
 0x22a   : > { %1122 = vmatprep.subr.mxu0 %v2754_v7  ;;  %1193 = vmatprep.subr.mxu1 %v2755_v10 }
 0x22b   : > { %1123 = vmatpush1.msra.mxu0 %v2756_v14  ;;  %1194 = vmatpush1.msra.mxu1 %v2757_v15 }
 0x22c   : > { %1124 = vmatprep.subr.mxu0 %v2758_v17  ;;  %1195 = vmatprep.subr.mxu1 %v2759_v21  ;;  %v920_v17 = vld [vmem:[#allocation2 + $0x10] sm:$0xff] }
 0x22d   : > { %1125 = vmatpush1.msra.mxu0 %v2760_v28  ;;  %1196 = vmatpush1.msra.mxu1 %v2761_v18  ;;  %v2771_v18 = vld [vmem:[#allocation5_spill] sm:$0xff]  ;;  %v924_v14 = vunpack.c.h.bf16 %v920_v17  ;;  %v923_v7 = vunpack.c.l.bf16 %v920_v17 }
 0x22e   : > { %1126 = vmatprep.subr.mxu0 %v2762_v8  ;;  %1197 = vmatprep.subr.mxu1 %v2763_v16  ;;  %v2772_v8 = vld [vmem:[#allocation6_spill] sm:$0xff] }
 0x22f   : > { %1127 = vmatpush1.msra.mxu0 %v2764_v19  ;;  %1198 = vmatpush1.msra.mxu1 %v2765_v20  ;;  %v919_v16 = vld [vmem:[#allocation2 + $0x18] sm:$0xff] }
 0x230   : > { %1128 = vmatprep.subr.mxu0 %v2766_v11  ;;  %1199 = vmatprep.subr.mxu1 %v2767_v12  ;;  %v921_v19 = vunpack.c.l.bf16 %v919_v16  ;;  %v922_v28 = vunpack.c.h.bf16 %v919_v16 }
 0x231   : > { %1129 = vmatpush1.msra.mxu0 %v2768_v9  ;;  %1162 = vmatprep.mubr.f32.mxu0 %v2769_v13 }
 0x232   : > { %1200 = vmatpush1.msra.mxu1 %v2770_v23  ;;  %1233 = vmatprep.mubr.f32.mxu1 %v2769_v13 }
 0x233   : > { %1271 = vmatprep.subr.mxu0 %v2771_v18  ;;  %1342 = vmatprep.subr.mxu1 %v2772_v8 }
 0x2d2   : > { %v991_v20 = vpop.f32.mrf.mxu0  ;;  %v1062_v21 = vpop.f32.mrf.mxu1 }
 0x2d3   : > { %v1067_v11 = vadd.f32 %v991_v20, %v921_v19  ;;  %v1069_v18 = vadd.f32 %v1062_v21, %v923_v7 }
 0x2d4   : > { %v993_v12 = vpop.f32.mrf.mxu0  ;;  %v1064_v10 = vpop.f32.mrf.mxu1 }
 0x2d5   : > { %v1071_v15 = vmul.f32 0.5, %v1067_v11  ;;  %v1068_v9 = vadd.f32 %v993_v12, %v922_v28  ;;  %v1070_v13 = vadd.f32 %v1064_v10, %v924_v14  ;;  %v1073_v8 = vmul.f32 0.5, %v1069_v18 }
 0x2d7   : > { %1810 = vtanh.f32 %v1071_v15  ;;  %v1072_v23 = vmul.f32 0.5, %v1068_v9 }
 0x2d9   : > { %1812 = vtanh.f32 %v1072_v23 }
 0x2da   : > { %1814 = vtanh.f32 %v1070_v13 }
 0x2db   : > { %1816 = vtanh.f32 %v1073_v8 }
 0x2e4   : > { %v1811_v6 = vpop.eup %1810 }
 0x2e5   : > { %v1077_v5 = vmul.f32 0.5, %v1811_v6 }
 0x2e6   : > { %v1813_v16 = vpop.eup %1812 }
 0x2e7   : > { %v1080_v3 = vadd.f32 0.5, %v1077_v5  ;;  %v1078_v19 = vmul.f32 0.5, %v1813_v16  ;;  %v1815_v27 = vpop.eup %1814  ;;  %v1265_v16 = vld [vmem:[#allocation2 + $0x28] sm:$0xff] }
 0x2e8   : > { %v1817_v10 = vpop.eup %1816 }
 0x2e9   : > { %v1081_v20 = vadd.f32 0.5, %v1078_v19  ;;  %v1085_v11 = vmul.f32 %v1815_v27, %v1080_v3  ;;  %v1079_v14 = vmul.f32 0.5, %v1817_v10  ;;  %v1267_v19 = vunpack.c.l.bf16 %v1265_v16 }
 0x2eb   : > { %v1084_v28 = vmul.f32 %v1081_v20, %v2494_v22  ;;  %v1082_v15 = vadd.f32 0.5, %v1079_v14  ;;  %v1268_v20 = vunpack.c.h.bf16 %v1265_v16  ;;  %v1266_v14 = vld [vmem:[#allocation2 + $0x38] sm:$0xff] }
 0x2ed   : > { %v2564_v12 = vadd.f32 %v1085_v11, %v1084_v28 }
 0x2ef   : > { %1818 = vtanh.f32 %v2564_v12 }
 0x2fc   : > { %v1819_v7 = vpop.eup %1818 }
 0x2fd   : > { %v1088_v17 = vmul.f32 %v1819_v7, %v1082_v15 }
 0x2ff   : > { %1163 = vmatmul.mubr.f32.vlgmr.msra.gmra.mxu0 %v1088_v17  ;;  %1234 = vmatmul.mubr.f32.vlgmr.msra.gmra.mxu1 %v1088_v17  ;;  %v1270_v17 = vunpack.c.h.bf16 %v1266_v14 }
 0x300   : > { %1272 = vmatpush1.msra.mxu0 %v2048_v24  ;;  %1343 = vmatpush1.msra.mxu1 %v2077_v30  ;;  %v2773_v24 = vld [vmem:[#allocation7_spill] sm:$0xff]  ;;  %v2777_v30 = vld [vmem:[#allocation10_spill] sm:$0xff] }
 0x301   : > { %1273 = vmatprep.subr.mxu0 %v2053_v25  ;;  %1344 = vmatprep.subr.mxu1 %v2089_v32  ;;  %v2774_v25 = vld [vmem:[#allocation9_spill] sm:$0xff]  ;;  %v2779_v32 = vld [vmem:[#allocation12_spill] sm:$0xff] }
 0x302   : > { %1274 = vmatpush1.msra.mxu0 %v2059_v26  ;;  %1345 = vmatpush1.msra.mxu1 %v2094_v33  ;;  %v2775_v26 = vld [vmem:[#allocation8_spill] sm:$0xff]  ;;  %v2780_v33 = vld [vmem:[#allocation15_spill] sm:$0xff] }
 0x303   : > { %1275 = vmatprep.subr.mxu0 %v2071_v29  ;;  %1346 = vmatprep.subr.mxu1 %v2106_v35  ;;  %v2776_v29 = vld [vmem:[#allocation11_spill] sm:$0xff]  ;;  %v2782_v35 = vld [vmem:[#allocation17_spill] sm:$0xff] }
 0x304   : > { %1276 = vmatpush1.msra.mxu0 %v2083_v31  ;;  %1347 = vmatpush1.msra.mxu1 %v2118_v37  ;;  %v2778_v31 = vld [vmem:[#allocation13_spill] sm:$0xff]  ;;  %v2784_v37 = vld [vmem:[#allocation19_spill] sm:$0xff] }
 0x305   : > { %1277 = vmatprep.subr.mxu0 %v2100_v34  ;;  %1348 = vmatprep.subr.mxu1 %v2123_v38  ;;  %v2781_v34 = vld [vmem:[#allocation14_spill] sm:$0xff] }
 0x306   : > { %1278 = vmatpush1.msra.mxu0 %v2112_v36  ;;  %1349 = vmatpush1.msra.mxu1 %v2135_v40  ;;  %v2783_v36 = vld [vmem:[#allocation16_spill] sm:$0xff]  ;;  %v2785_v38 = vld [vmem:[#allocation18_spill] sm:$0xff] }
 0x307   : > { %1279 = vmatprep.subr.mxu0 %v2129_v39  ;;  %1350 = vmatprep.subr.mxu1 %v2147_v42  ;;  %v2786_v39 = vld [vmem:[#allocation21_spill] sm:$0xff]  ;;  %v2787_v40 = vld [vmem:[#allocation20_spill] sm:$0xff]  ;;  %v2789_v42 = vld [vmem:[#allocation22_spill] sm:$0xff] }
 0x308   : > { %1280 = vmatpush1.msra.mxu0 %v2141_v41  ;;  %1351 = vmatpush1.msra.mxu1 %v2159_v44  ;;  %v2788_v41 = vld [vmem:[#allocation23_spill] sm:$0xff]  ;;  %v2791_v44 = vld [vmem:[#allocation24_spill] sm:$0xff] }
 0x309   : > { %1281 = vmatprep.subr.mxu0 %v2153_v43  ;;  %1352 = vmatprep.subr.mxu1 %v2171_v46  ;;  %v2790_v43 = vld [vmem:[#allocation25_spill] sm:$0xff]  ;;  %v2793_v46 = vld [vmem:[#allocation26_spill] sm:$0xff] }
 0x30a   : > { %1282 = vmatpush1.msra.mxu0 %v2165_v45  ;;  %1353 = vmatpush1.msra.mxu1 %v2183_v48  ;;  %v2792_v45 = vmov 0.0  }
 0x30b   : > { %1283 = vmatprep.subr.mxu0 %v2177_v47  ;;  %1354 = vmatprep.subr.mxu1 %v2195_v50  ;;  %v1092_v47 = vld [vmem:[#allocation2 + $0x8] sm:$0xff] }
 0x30c   : > { %1284 = vmatpush1.msra.mxu0 %v2189_v49  ;;  %1355 = vmatpush1.msra.mxu1 %v2207_v52  ;;  %v1094_v48 = vunpack.c.l.bf16 %v1092_v47  ;;  %v1095_v49 = vunpack.c.h.bf16 %v1092_v47 }
 0x30d   : > { %1285 = vmatprep.subr.mxu0 %v2201_v51  ;;  %1356 = vmatprep.subr.mxu1 %v2219_v54 }
 0x30e   : > { %1286 = vmatpush1.msra.mxu0 %v2213_v53  ;;  %1357 = vmatpush1.msra.mxu1 %v2231_v56  ;;  %v1093_v53 = vld [vmem:[#allocation2 + $0x20] sm:$0xff] }
 0x30f   : > { %1287 = vmatprep.subr.mxu0 %v2225_v55  ;;  %1358 = vmatprep.subr.mxu1 %v2243_v58 }
 0x310   : > { %1288 = vmatpush1.msra.mxu0 %v2237_v57  ;;  %1359 = vmatpush1.msra.mxu1 %v2255_v60  ;;  %v1097_v57 = vunpack.c.h.bf16 %v1093_v53 }
 0x311   : > { %1289 = vmatprep.subr.mxu0 %v2249_v59  ;;  %1360 = vmatprep.subr.mxu1 %v2267_v62 }
 0x312   : > { %1290 = vmatpush1.msra.mxu0 %v2261_v61  ;;  %1361 = vmatpush1.msra.mxu1 %v2279_v0  ;;  %v1096_v61 = vunpack.c.l.bf16 %v1093_v53 }
 0x313   : > { %1291 = vmatprep.subr.mxu0 %v2273_v63  ;;  %1362 = vmatprep.subr.mxu1 %v2291_v2 }
 0x314   : > { %1292 = vmatpush1.msra.mxu0 %v2285_v1  ;;  %1363 = vmatpush1.msra.mxu1 %v2303_v4 }
 0x315   : > { %1293 = vmatprep.subr.mxu0 %v2773_v24  ;;  %1364 = vmatprep.subr.mxu1 %v2774_v25 }
 0x316   : > { %1294 = vmatpush1.msra.mxu0 %v2775_v26  ;;  %1365 = vmatpush1.msra.mxu1 %v2776_v29  ;;  %v1269_v29 = vunpack.c.l.bf16 %v1266_v14 }
 0x317   : > { %1295 = vmatprep.subr.mxu0 %v2777_v30  ;;  %1366 = vmatprep.subr.mxu1 %v2778_v31 }
 0x318   : > { %1296 = vmatpush1.msra.mxu0 %v2779_v32  ;;  %1367 = vmatpush1.msra.mxu1 %v2780_v33 }
 0x319   : > { %1297 = vmatprep.subr.mxu0 %v2781_v34  ;;  %1368 = vmatprep.subr.mxu1 %v2782_v35 }
 0x31a   : > { %1298 = vmatpush1.msra.mxu0 %v2783_v36  ;;  %1369 = vmatpush1.msra.mxu1 %v2784_v37 }
 0x31b   : > { %1299 = vmatprep.subr.mxu0 %v2785_v38  ;;  %1370 = vmatprep.subr.mxu1 %v2786_v39 }
 0x31c   : > { %1300 = vmatpush1.msra.mxu0 %v2787_v40  ;;  %1371 = vmatpush1.msra.mxu1 %v2788_v41 }
 0x31d   : > { %1301 = vmatprep.subr.mxu0 %v2789_v42  ;;  %1372 = vmatprep.subr.mxu1 %v2790_v43 }
 0x31e   : > { %1302 = vmatpush1.msra.mxu0 %v2791_v44  ;;  %1335 = vmatprep.mubr.f32.mxu0 %v2792_v45 }
 0x31f   : > { %1373 = vmatpush1.msra.mxu1 %v2793_v46  ;;  %1406 = vmatprep.mubr.f32.mxu1 %v2792_v45 }
 0x3bf   : > { %v1164_v50 = vpop.f32.mrf.mxu0  ;;  %v1235_v51 = vpop.f32.mrf.mxu1 }
 0x3c0   : > { %v1240_v52 = vadd.f32 %v1164_v50, %v1094_v48  ;;  %v1242_v62 = vadd.f32 %v1235_v51, %v1096_v61 }
 0x3c1   : > { %v1166_v54 = vpop.f32.mrf.mxu0  ;;  %v1237_v58 = vpop.f32.mrf.mxu1 }
 0x3c2   : > { %v1244_v55 = vmul.f32 0.5, %v1240_v52  ;;  %v1241_v56 = vadd.f32 %v1166_v54, %v1095_v49  ;;  %v1243_v60 = vadd.f32 %v1237_v58, %v1097_v57  ;;  %v1246_v63 = vmul.f32 0.5, %v1242_v62 }
 0x3c4   : > { %1820 = vtanh.f32 %v1244_v55  ;;  %v1245_v59 = vmul.f32 0.5, %v1241_v56 }
 0x3c6   : > { %1822 = vtanh.f32 %v1245_v59 }
 0x3c7   : > { %1824 = vtanh.f32 %v1243_v60 }
 0x3c8   : > { %1826 = vtanh.f32 %v1246_v63 }
 0x3d1   : > { %v1821_v0 = vpop.eup %1820 }
 0x3d2   : > { %v1250_v1 = vmul.f32 0.5, %v1821_v0 }
 0x3d3   : > { %v1823_v2 = vpop.eup %1822 }
 0x3d4   : > { %v1253_v4 = vadd.f32 0.5, %v1250_v1  ;;  %v1251_v22 = vmul.f32 0.5, %v1823_v2  ;;  %v1825_v3 = vpop.eup %1824 }
 0x3d5   : > { %v1827_v9 = vpop.eup %1826 }
 0x3d6   : > { %v1254_v27 = vadd.f32 0.5, %v1251_v22  ;;  %v1258_v6 = vmul.f32 %v1825_v3, %v1253_v4  ;;  %v1252_v13 = vmul.f32 0.5, %v1827_v9 }
 0x3d8   : > { %v1257_v5 = vmul.f32 %v1254_v27, %v2564_v12  ;;  %v1255_v23 = vadd.f32 0.5, %v1252_v13 }
 0x3da   : > { %v1259_v21 = vadd.f32 %v1258_v6, %v1257_v5 }
 0x3dc   : > { %1828 = vtanh.f32 %v1259_v21 }
 0x3e9   : > { %v1829_v18 = vpop.eup %1828 }
 0x3ea   : > { %v1261_v8 = vmul.f32 %v1829_v18, %v1255_v23 }
 0x3ec   : > { %1336 = vmatmul.mubr.f32.vlgmr.msra.gmra.mxu0 %v1261_v8  ;;  %1407 = vmatmul.mubr.f32.vlgmr.msra.gmra.mxu1 %v1261_v8 }
 0x4ac   : > { %v1337_v28 = vpop.f32.mrf.mxu0  ;;  %v1408_v11 = vpop.f32.mrf.mxu1 }
 0x4ad   : > { %v1413_v10 = vadd.f32 %v1337_v28, %v1267_v19  ;;  %v1415_v30 = vadd.f32 %v1408_v11, %v1269_v29 }
 0x4ae   : > { %v1339_v15 = vpop.f32.mrf.mxu0  ;;  %v1410_v24 = vpop.f32.mrf.mxu1 }
 0x4af   : > { %v1417_v7 = vmul.f32 0.5, %v1413_v10  ;;  %v1414_v12 = vadd.f32 %v1339_v15, %v1268_v20  ;;  %v1416_v26 = vadd.f32 %v1410_v24, %v1270_v17  ;;  %v1419_v31 = vmul.f32 0.5, %v1415_v30 }
 0x4b1   : > { %1830 = vtanh.f32 %v1417_v7  ;;  %v1418_v25 = vmul.f32 0.5, %v1414_v12 }
 0x4b3   : > { %1832 = vtanh.f32 %v1418_v25 }
 0x4b4   : > { %1834 = vtanh.f32 %v1416_v26 }
 0x4b5   : > { %1836 = vtanh.f32 %v1419_v31 }
 0x4be   : > { %v1831_v32 = vpop.eup %1830 }
 0x4bf   : > { %v1423_v33 = vmul.f32 0.5, %v1831_v32 }
 0x4c0   : > { %v1833_v34 = vpop.eup %1832 }
 0x4c1   : > { %v1426_v35 = vadd.f32 0.5, %v1423_v33  ;;  %v1424_v36 = vmul.f32 0.5, %v1833_v34  ;;  %v1835_v38 = vpop.eup %1834 }
 0x4c2   : > { %v1837_v42 = vpop.eup %1836 }
 0x4c3   : > { %v1427_v37 = vadd.f32 0.5, %v1424_v36  ;;  %v1431_v40 = vmul.f32 %v1835_v38, %v1426_v35  ;;  %v1425_v43 = vmul.f32 0.5, %v1837_v42 }
 0x4c5   : > { %v1430_v39 = vmul.f32 %v1427_v37, %v1259_v21  ;;  %v1428_v44 = vadd.f32 0.5, %v1425_v43 }
 0x4c7   : > { %v1432_v41 = vadd.f32 %v1431_v40, %v1430_v39 }
 0x4c9   : > { %1838 = vtanh.f32 %v1432_v41  ;;  %1436 = vst [vmem:[#allocation4] sm:$0xff] %v1432_v41 }
 0x4d5   : > { %1440 = sbr.rel (%p1671_p6) target bundleno = 1474 (0x5c2), region = 52 }
 0x4d6   : > { %v1839_v45 = vpop.eup %1838 }
 0x4d7   : > { %v1434_v46 = vmul.f32 %v1839_v45, %v1428_v44 }
 0x4d9   : > { %1435 = vst [vmem:[#allocation3] sm:$0xff] %v1434_v46 }
 0x4da   : > { %v1840_v47 = vld [vmem:[%s2676_s4 + $0x38] sm:$0xff]   ;;  %v1875_v48 = vmov 0.0   ;;  %v1841_v49 = vld [vmem:[%s2676_s4 + $0x30] sm:$0xff]   ;;  %vm1876_vm0 = vmmov 0   ;;  %v1842_v50 = vld [vmem:[%s2676_s4 + $0x28] sm:$0xff]   ;;  %v1441_v56 = vpack.c.bf16 %v1434_v46, %v1434_v46 }
 0x4db   : > { %1701 = vmatprep.subr.bf16.mxu0 %v1875_v48  ;;  %1717 = vmatprep.mubr.msk.bf16.mxu0 %vm1876_vm0, %v1875_v48  ;;  %v1843_v51 = vld [vmem:[%s2676_s4 + $0x20] sm:$0xff]   ;;  %v1844_v52 = vld [vmem:[%s2676_s4 + $0x18] sm:$0xff]   ;;  %v1845_v53 = vld [vmem:[%s2676_s4 + $0x10] sm:$0xff]  }
 0x4dc   : > { %1702 = vmatpush3.bf16.msra.mxu0 %v1840_v47  ;;  %v1846_v54 = vld [vmem:[%s2676_s4 + $0x8] sm:$0xff]   ;;  %v1847_v55 = vld [vmem:[%s2676_s4] sm:$0xff]  }
 0x4dd   : > { %1703 = vmatprep.subr.bf16.mxu0 %v1875_v48  ;;  %v1672_v57 = vld [vmem:[%s2677_s5] ss:$0 sm:$0xff] }
 0x4e0   : > { %1704 = vmatpush3.bf16.msra.mxu0 %v1841_v49 }
 0x4e1   : > { %1705 = vmatprep.subr.bf16.mxu0 %v1875_v48 }
 0x4e4   : > { %1706 = vmatpush3.bf16.msra.mxu0 %v1842_v50 }
 0x4e5   : > { %1707 = vmatprep.subr.bf16.mxu0 %v1875_v48 }
 0x4e8   : > { %1708 = vmatpush3.bf16.msra.mxu0 %v1843_v51 }
 0x4e9   : > { %1709 = vmatprep.subr.bf16.mxu0 %v1875_v48 }
 0x4ec   : > { %1710 = vmatpush3.bf16.msra.mxu0 %v1844_v52 }
 0x4ed   : > { %1711 = vmatprep.subr.bf16.mxu0 %v1875_v48 }
 0x4f0   : > { %1712 = vmatpush3.bf16.msra.mxu0 %v1845_v53 }
 0x4f1   : > { %1713 = vmatprep.subr.bf16.mxu0 %v1875_v48 }
 0x4f4   : > { %1714 = vmatpush3.bf16.msra.mxu0 %v1846_v54 }
 0x4f5   : > { %1715 = vmatprep.subr.bf16.mxu0 %v1875_v48 }
 0x4f8   : > { %1716 = vmatpush3.bf16.msra.mxu0 %v1847_v55 }
 0x4fb   : > { %1718 = vmatmul.mubr.bf16.vlgmr.msra.gmra.mxu0 %v1441_v56 }
 0x5bb   : > { %v1547_v58 = vpop.f32.mrf.mxu0 }
 0x5bc   : > { %v1548_v59 = vadd.f32 %v1672_v57, %v1547_v58 }
 0x5bd   : > { %v1719_v60 = vpop.f32.mrf.mxu0 }
 0x5be   : > { %1553 = vst [vmem:[%s2678_s6] sm:$0xff] %v1548_v59 }
 0x5bf   : > { %v1550_v61 = vpop.f32.mrf.mxu0 }
 0x5c1   : > { %v1720_v62 = vpop.f32.mrf.mxu0 }
 0x5c2 PF: > { %s16_s23 = sadd.s32 1, %s1870_s23   ;;  %s2794_s21 = smov %s1866_s22 }
 0x5c3   : > { %p13_p7 = scmp.ge.s32.totalorder %s16_s23, 4   ;;  %s2795_s22 = smov %s2797_s24 }
 0x5c5   :  { %15 = sbr.rel (!%p13_p7) target bundleno = 2 (0x2), region = 86 }

</bundles_post_ra>
